<compile_context>
chip_gen: v7x
topology: tpu7x:2x2x1
jax: 0.10.0
libtpu: 0.0.40
codegen_flags: <defaults>
</compile_context>

<pallas_src>
import functools

import jax
import jax.numpy as jnp
from jax import lax
from jax.experimental import pallas as pl
from jax.experimental.pallas import tpu as pltpu


# ----------------------------- in-kernel helpers -----------------------------

def _layernorm(x, g, b, eps):
    # One-pass f32 layernorm: var = E[x^2] - mean^2 (saves a full elementwise pass vs two-pass).
    m1 = jnp.mean(x, axis=-1, keepdims=True)
    m2 = jnp.mean(x * x, axis=-1, keepdims=True)
    var = m2 - m1 * m1
    return (x - m1) * lax.rsqrt(var + eps) * g + b


def _bdot(a, b, ca, cb):
    """Head-batched matmul: batch over leading dim 0, contract a[ca] with b[cb], f32 accumulate."""
    return lax.dot_general(
        a.astype(jnp.bfloat16), b.astype(jnp.bfloat16),
        (((ca,), (cb,)), ((0,), (0,))),
        preferred_element_type=jnp.float32)


# ----------------------------- fused whole-model kernel -----------------------------

def _vit_kernel(patch_ref, pw_ref, poscls_ref, preg_ref, preb_ref,
                ln1g_ref, ln1b_ref, wq_ref, wk_ref, wv_ref, bq_ref, bk_ref, bv_ref,
                wo_ref, bo_ref, ln2g_ref, ln2b_ref, w1_ref, b1_ref, w2_ref, b2_ref,
                o_ref, *, num_layers, num_heads, eps):
    # ---- embeddings: patch matmul + (class + position) add + pre-layernorm ----
    p = patch_ref[0].astype(jnp.bfloat16)                                  # (S, CPP)
    h = jnp.dot(p, pw_ref[...], preferred_element_type=jnp.float32)       # (S, D) f32
    h = h + poscls_ref[...]                                                # class emb folded in row 0
    h = _layernorm(h, preg_ref[...], preb_ref[...], eps)

    S, D = h.shape
    H = num_heads

    for l in range(num_layers):        # static unroll; all layer weights resident in VMEM
        # ---- self-attention (heads as a dot_general batch dim; no per-head loop/slicing) ----
        x_ln = _layernorm(h, ln1g_ref[l], ln1b_ref[l], eps).astype(jnp.bfloat16)   # (S, D)
        xb = jnp.broadcast_to(x_ln[None], (H, S, D))                               # (H, S, D) bf16

        q = _bdot(xb, wq_ref[l], 2, 1) + bq_ref[l]                                 # (H, S, dh); scale pre-folded
        k = _bdot(xb, wk_ref[l], 2, 1) + bk_ref[l]                                 # (H, S, dh)
        v = _bdot(xb, wv_ref[l], 2, 1) + bv_ref[l]                                 # (H, S, dh)

        s = _bdot(q, k, 2, 2)                                                      # (H, S, S) f32
        s = s - jnp.max(s, axis=-1, keepdims=True)
        e = jnp.exp(s)
        pattn = e * pl.reciprocal(jnp.sum(e, axis=-1, keepdims=True), approx=True)

        ctx = _bdot(pattn, v, 2, 1)                                                # (H, S, dh)
        proj = _bdot(ctx, wo_ref[l], 2, 1)                                         # (H, S, D)
        h = h + jnp.sum(proj, axis=0) + bo_ref[l]          # sum over heads == concat(heads) @ Wo

        # ---- MLP (quick_gelu) ----
        x_ln2 = _layernorm(h, ln2g_ref[l], ln2b_ref[l], eps).astype(jnp.bfloat16)
        ff = jnp.dot(x_ln2, w1_ref[l], preferred_element_type=jnp.float32) + b1_ref[l]   # (S, I)
        ff = ff * jax.nn.sigmoid(1.702 * ff)                                             # quick_gelu (f32)
        h = h + jnp.dot(ff.astype(jnp.bfloat16), w2_ref[l],
                        preferred_element_type=jnp.float32) + b2_ref[l]

    o_ref[0] = h


# ----------------------------- kernel wrapper -----------------------------

def pallas_vit(patches_tok, pos_cls, params, cfg):
    """patches_tok: (B, S, CPP) with a zero CLS row; returns (B, S, D) encoder output."""
    B, S, CPP = patches_tok.shape
    D = cfg.hidden_size
    I = cfg.intermediate_size
    L = cfg.num_layers
    H = cfg.num_heads

    def const(a):
        # Full-array block with a constant index_map (weights stay resident across grid steps).
        nd = a.ndim
        return pl.BlockSpec(a.shape, lambda b, _nd=nd: (0,) * _nd)

    weights = [
        params["patch_w"], pos_cls, params["pre_ln_g"], params["pre_ln_b"],
        params["ln1_g"], params["ln1_b"],
        params["wq"], params["wk"], params["wv"],
        params["bq"], params["bk"], params["bv"],
        params["wo"], params["bo"], params["ln2_g"], params["ln2_b"],
        params["fc1_w"], params["fc1_b"], params["fc2_w"], params["fc2_b"],
    ]

    # Advisory cost estimate so XLA schedules/overlaps this small custom call sensibly.
    flops = B * (2 * S * CPP * D + L * (8 * S * D * D + 4 * S * S * D + 4 * S * D * I))
    transcendentals = B * L * (H * S * S + S * I)
    bytes_accessed = (patches_tok.size * patches_tok.dtype.itemsize
                      + sum(int(w.size) * w.dtype.itemsize for w in weights)
                      + B * S * D * 4)

    return pl.pallas_call(
        functools.partial(_vit_kernel, num_layers=L, num_heads=H, eps=cfg.layer_norm_eps),
        grid=(B,),
        in_specs=[pl.BlockSpec((1, S, CPP), lambda b: (b, 0, 0))] + [const(w) for w in weights],
        out_specs=pl.BlockSpec((1, S, D), lambda b: (b, 0, 0)),
        out_shape=jax.ShapeDtypeStruct((B, S, D), jnp.float32),
        compiler_params=pltpu.CompilerParams(dimension_semantics=("parallel",)),
        cost_estimate=pl.CostEstimate(flops=int(flops),
                                      transcendentals=int(transcendentals),
                                      bytes_accessed=int(bytes_accessed)),
    )(patches_tok, *weights)


# ----------------------------- model definition -----------------------------

class Config:
    # Scaled-down synthetic analogue of openai/clip-vit-base-patch32 vision config.
    image_size = 16
    patch_size = 8
    num_channels = 3
    hidden_size = 64          # (real model: 768)
    num_heads = 4
    num_layers = 2
    intermediate_size = 256   # 4x hidden, like CLIP MLP
    layer_norm_eps = 1e-5


def init_params(cfg, key):
    D = cfg.hidden_size
    P = cfg.patch_size
    C = cfg.num_channels
    I = cfg.intermediate_size
    L = cfg.num_layers
    H = cfg.num_heads
    dh = D // H
    num_patches = (cfg.image_size // P) ** 2
    S = num_patches + 1
    scale = dh ** -0.5

    keys = iter(jax.random.split(key, 16))

    def nrm(shape, dtype=jnp.float32, std=0.02):
        return (std * jax.random.normal(next(keys), shape, dtype=jnp.float32)).astype(dtype)

    return {
        # conv weight (D, C, P, P) flattened to (C*P*P, D) (patch conv has no bias); bf16 for MXU.
        "patch_w": nrm((C * P * P, D), jnp.bfloat16),
        "class_embedding": nrm((1, D)),
        "position_embedding": nrm((S, D)),
        "pre_ln_g": jnp.ones((1, D), jnp.float32),
        "pre_ln_b": jnp.zeros((1, D), jnp.float32),
        # Per-layer weights stacked along a leading L axis (whole-model fusion).
        "ln1_g": jnp.ones((L, 1, D), jnp.float32),
        "ln1_b": jnp.zeros((L, 1, D), jnp.float32),
        # Per-head q/k/v projections in (L, H, D_in, dh) layout; q has the attention scale folded
        # in.  (To load real HF weights: W_(out,in) -> transpose -> split columns per head.)
        "wq": (scale * nrm((L, H, D, dh))).astype(jnp.bfloat16),
        "wk": nrm((L, H, D, dh), jnp.bfloat16),
        "wv": nrm((L, H, D, dh), jnp.bfloat16),
        "bq": jnp.zeros((L, H, 1, dh), jnp.float32),
        "bk": jnp.zeros((L, H, 1, dh), jnp.float32),
        "bv": jnp.zeros((L, H, 1, dh), jnp.float32),
        # Output projection split per head: (L, H, dh, D); sum over heads == concat(heads) @ Wo.
        "wo": nrm((L, H, dh, D), jnp.bfloat16),
        "bo": jnp.zeros((L, 1, D), jnp.float32),
        "ln2_g": jnp.ones((L, 1, D), jnp.float32),
        "ln2_b": jnp.zeros((L, 1, D), jnp.float32),
        "fc1_w": nrm((L, D, I), jnp.bfloat16),
        "fc1_b": jnp.zeros((L, 1, I), jnp.float32),
        "fc2_w": nrm((L, I, D), jnp.bfloat16),
        "fc2_b": jnp.zeros((L, 1, D), jnp.float32),
    }


def pubmed_clip_vit_forward(params, x, cfg):
    """x: (B, C, H, W) NCHW.  Returns (B, num_patches, D) == last_hidden_state[:, 1:, :]."""
    B, C, Himg, Wimg = x.shape
    P = cfg.patch_size
    Hp, Wp = Himg // P, Wimg // P
    num_patches = Hp * Wp
    S = num_patches + 1
    CPP = C * P * P

    # Patch "conv" (stride == kernel) == unfold; pure layout work, done at the XLA level.
    patches = (x.reshape(B, C, Hp, P, Wp, P)
                 .transpose(0, 2, 4, 1, 3, 5)
                 .reshape(B, num_patches, CPP))
    # Prepend a zero "CLS" patch row so the embedding matmul produces all S token rows in one go.
    patches_tok = jnp.concatenate([jnp.zeros((B, 1, CPP), patches.dtype), patches], axis=1)
    # Position embedding with the class embedding folded into row 0.
    pos_cls = params["position_embedding"] + jnp.pad(params["class_embedding"],
                                                     ((0, S - 1), (0, 0)))

    hidden = pallas_vit(patches_tok, pos_cls, params, cfg)

    # HF CLIPVisionTransformer: last_hidden_state is the raw encoder output (post_layernorm only
    # applies to the pooled CLS token, which is discarded here).  Drop the CLS token.
    return hidden[:, 1:, :]


# ----------------------------- main -----------------------------

if __name__ == "__main__":
    cfg = Config()
    key = jax.random.PRNGKey(0)
    pkey, xkey = jax.random.split(key)

    params = init_params(cfg, pkey)
    x = jax.random.normal(
        xkey, (2, cfg.num_channels, cfg.image_size, cfg.image_size), dtype=jnp.float32
    )

    fwd = jax.jit(functools.partial(pubmed_clip_vit_forward, cfg=cfg))
    out = jax.block_until_ready(fwd(params, x))

    num_patches = (cfg.image_size // cfg.patch_size) ** 2
    assert out.shape == (2, num_patches, cfg.hidden_size), out.shape
    assert out.dtype == jnp.float32
    print("KERNEL_OK")
</pallas_src>

<mosaic_0001>
module attributes {stable_mosaic.version = 11 : i64} {
  func.func @_vit_kernel(%arg0: i32, %arg1: memref<1x5x192xf32, #tpu.memory_space<vmem>>, %arg2: memref<192x64xbf16, #tpu.memory_space<vmem>>, %arg3: memref<5x64xf32, #tpu.memory_space<vmem>>, %arg4: memref<1x64xf32, #tpu.memory_space<vmem>>, %arg5: memref<1x64xf32, #tpu.memory_space<vmem>>, %arg6: memref<2x1x64xf32, #tpu.memory_space<vmem>>, %arg7: memref<2x1x64xf32, #tpu.memory_space<vmem>>, %arg8: memref<2x4x64x16xbf16, #tpu.memory_space<vmem>>, %arg9: memref<2x4x64x16xbf16, #tpu.memory_space<vmem>>, %arg10: memref<2x4x64x16xbf16, #tpu.memory_space<vmem>>, %arg11: memref<2x4x1x16xf32, #tpu.memory_space<vmem>>, %arg12: memref<2x4x1x16xf32, #tpu.memory_space<vmem>>, %arg13: memref<2x4x1x16xf32, #tpu.memory_space<vmem>>, %arg14: memref<2x4x16x64xbf16, #tpu.memory_space<vmem>>, %arg15: memref<2x1x64xf32, #tpu.memory_space<vmem>>, %arg16: memref<2x1x64xf32, #tpu.memory_space<vmem>>, %arg17: memref<2x1x64xf32, #tpu.memory_space<vmem>>, %arg18: memref<2x64x256xbf16, #tpu.memory_space<vmem>>, %arg19: memref<2x1x256xf32, #tpu.memory_space<vmem>>, %arg20: memref<2x256x64xbf16, #tpu.memory_space<vmem>>, %arg21: memref<2x1x64xf32, #tpu.memory_space<vmem>>, %arg22: memref<1x5x64xf32, #tpu.memory_space<vmem>>) attributes {dimension_semantics = [#tpu.dimension_semantics<parallel>], iteration_bounds = array<i64: 2>, scalar_prefetch = 0 : i64, scratch_operands = 0 : i64, tpu.core_type = #tpu.core_type<tc>, window_params = [{transform_indices = @transform_0, window_bounds = array<i64: 1, 5, 192>}, {pipeline_mode = #tpu.pipeline_mode<synchronous>, transform_indices = @transform_1, window_bounds = array<i64: 192, 64>}, {pipeline_mode = #tpu.pipeline_mode<synchronous>, transform_indices = @transform_2, window_bounds = array<i64: 5, 64>}, {pipeline_mode = #tpu.pipeline_mode<synchronous>, transform_indices = @transform_3, window_bounds = array<i64: 1, 64>}, {pipeline_mode = #tpu.pipeline_mode<synchronous>, transform_indices = @transform_4, window_bounds = array<i64: 1, 64>}, {pipeline_mode = #tpu.pipeline_mode<synchronous>, transform_indices = @transform_5, window_bounds = array<i64: 2, 1, 64>}, {pipeline_mode = #tpu.pipeline_mode<synchronous>, transform_indices = @transform_6, window_bounds = array<i64: 2, 1, 64>}, {pipeline_mode = #tpu.pipeline_mode<synchronous>, transform_indices = @transform_7, window_bounds = array<i64: 2, 4, 64, 16>}, {pipeline_mode = #tpu.pipeline_mode<synchronous>, transform_indices = @transform_8, window_bounds = array<i64: 2, 4, 64, 16>}, {pipeline_mode = #tpu.pipeline_mode<synchronous>, transform_indices = @transform_9, window_bounds = array<i64: 2, 4, 64, 16>}, {pipeline_mode = #tpu.pipeline_mode<synchronous>, transform_indices = @transform_10, window_bounds = array<i64: 2, 4, 1, 16>}, {pipeline_mode = #tpu.pipeline_mode<synchronous>, transform_indices = @transform_11, window_bounds = array<i64: 2, 4, 1, 16>}, {pipeline_mode = #tpu.pipeline_mode<synchronous>, transform_indices = @transform_12, window_bounds = array<i64: 2, 4, 1, 16>}, {pipeline_mode = #tpu.pipeline_mode<synchronous>, transform_indices = @transform_13, window_bounds = array<i64: 2, 4, 16, 64>}, {pipeline_mode = #tpu.pipeline_mode<synchronous>, transform_indices = @transform_14, window_bounds = array<i64: 2, 1, 64>}, {pipeline_mode = #tpu.pipeline_mode<synchronous>, transform_indices = @transform_15, window_bounds = array<i64: 2, 1, 64>}, {pipeline_mode = #tpu.pipeline_mode<synchronous>, transform_indices = @transform_16, window_bounds = array<i64: 2, 1, 64>}, {pipeline_mode = #tpu.pipeline_mode<synchronous>, transform_indices = @transform_17, window_bounds = array<i64: 2, 64, 256>}, {pipeline_mode = #tpu.pipeline_mode<synchronous>, transform_indices = @transform_18, window_bounds = array<i64: 2, 1, 256>}, {pipeline_mode = #tpu.pipeline_mode<synchronous>, transform_indices = @transform_19, window_bounds = array<i64: 2, 256, 64>}, {pipeline_mode = #tpu.pipeline_mode<synchronous>, transform_indices = @transform_20, window_bounds = array<i64: 2, 1, 64>}, {transform_indices = @transform_21, window_bounds = array<i64: 1, 5, 64>}]} {
    %c0 = arith.constant 0 : index
    %c0_0 = arith.constant 0 : index
    %c0_1 = arith.constant 0 : index
    %0 = vector.load %arg1[%c0, %c0_0, %c0_1] : memref<1x5x192xf32, #tpu.memory_space<vmem>>, vector<1x5x192xf32>
    %1 = vector.shape_cast %0 : vector<1x5x192xf32> to vector<5x192xf32>
    %2 = arith.truncf %1 : vector<5x192xf32> to vector<5x192xbf16>
    %c0_2 = arith.constant 0 : index
    %c0_3 = arith.constant 0 : index
    %3 = vector.load %arg2[%c0_2, %c0_3] : memref<192x64xbf16, #tpu.memory_space<vmem>>, vector<192x64xbf16>
    %cst = arith.constant dense<0.000000e+00> : vector<5x64xf32>
    %4 = tpu.matmul %2, %3, %cst {dimension_numbers = #tpu.dot_dimension_numbers<[1], [0], [0], [1], [0, 0, 1, 1], [], []>} : vector<5x192xbf16>, vector<192x64xbf16>, vector<5x64xf32> -> vector<5x64xf32>
    %c0_4 = arith.constant 0 : index
    %c0_5 = arith.constant 0 : index
    %5 = vector.load %arg3[%c0_4, %c0_5] : memref<5x64xf32, #tpu.memory_space<vmem>>, vector<5x64xf32>
    %6 = arith.addf %4, %5 : vector<5x64xf32>
    %c0_6 = arith.constant 0 : index
    %c0_7 = arith.constant 0 : index
    %7 = vector.load %arg4[%c0_6, %c0_7] : memref<1x64xf32, #tpu.memory_space<vmem>>, vector<1x64xf32>
    %c0_8 = arith.constant 0 : index
    %c0_9 = arith.constant 0 : index
    %8 = vector.load %arg5[%c0_8, %c0_9] : memref<1x64xf32, #tpu.memory_space<vmem>>, vector<1x64xf32>
    %cst_10 = arith.constant dense<0.000000e+00> : vector<5xf32>
    %9 = vector.multi_reduction <add>, %6, %cst_10 [1] : vector<5x64xf32> to vector<5xf32>
    %10 = vector.shape_cast %9 : vector<5xf32> to vector<5x1xf32>
    %cst_11 = arith.constant 6.400000e+01 : f32
    %11 = vector.broadcast %cst_11 : f32 to vector<5x1xf32>
    %12 = arith.divf %10, %11 : vector<5x1xf32>
    %13 = arith.mulf %6, %6 : vector<5x64xf32>
    %cst_12 = arith.constant dense<0.000000e+00> : vector<5xf32>
    %14 = vector.multi_reduction <add>, %13, %cst_12 [1] : vector<5x64xf32> to vector<5xf32>
    %15 = vector.shape_cast %14 : vector<5xf32> to vector<5x1xf32>
    %cst_13 = arith.constant 6.400000e+01 : f32
    %16 = vector.broadcast %cst_13 : f32 to vector<5x1xf32>
    %17 = arith.divf %15, %16 : vector<5x1xf32>
    %18 = arith.mulf %12, %12 : vector<5x1xf32>
    %19 = arith.subf %17, %18 : vector<5x1xf32>
    %20 = vector.broadcast %12 : vector<5x1xf32> to vector<5x64xf32>
    %21 = arith.subf %6, %20 : vector<5x64xf32>
    %cst_14 = arith.constant 9.99999974E-6 : f32
    %22 = vector.broadcast %cst_14 : f32 to vector<5x1xf32>
    %23 = arith.addf %19, %22 : vector<5x1xf32>
    %24 = math.rsqrt %23 : vector<5x1xf32>
    %25 = vector.broadcast %24 : vector<5x1xf32> to vector<5x64xf32>
    %26 = arith.mulf %21, %25 : vector<5x64xf32>
    %27 = vector.broadcast %7 : vector<1x64xf32> to vector<5x64xf32>
    %28 = arith.mulf %26, %27 : vector<5x64xf32>
    %29 = vector.broadcast %8 : vector<1x64xf32> to vector<5x64xf32>
    %30 = arith.addf %28, %29 : vector<5x64xf32>
    %c0_15 = arith.constant 0 : index
    %c0_16 = arith.constant 0 : index
    %c0_17 = arith.constant 0 : index
    %31 = vector.load %arg6[%c0_15, %c0_16, %c0_17] : memref<2x1x64xf32, #tpu.memory_space<vmem>>, vector<1x1x64xf32>
    %32 = vector.shape_cast %31 : vector<1x1x64xf32> to vector<1x64xf32>
    %c0_18 = arith.constant 0 : index
    %c0_19 = arith.constant 0 : index
    %c0_20 = arith.constant 0 : index
    %33 = vector.load %arg7[%c0_18, %c0_19, %c0_20] : memref<2x1x64xf32, #tpu.memory_space<vmem>>, vector<1x1x64xf32>
    %34 = vector.shape_cast %33 : vector<1x1x64xf32> to vector<1x64xf32>
    %cst_21 = arith.constant dense<0.000000e+00> : vector<5xf32>
    %35 = vector.multi_reduction <add>, %30, %cst_21 [1] : vector<5x64xf32> to vector<5xf32>
    %36 = vector.shape_cast %35 : vector<5xf32> to vector<5x1xf32>
    %cst_22 = arith.constant 6.400000e+01 : f32
    %37 = vector.broadcast %cst_22 : f32 to vector<5x1xf32>
    %38 = arith.divf %36, %37 : vector<5x1xf32>
    %39 = arith.mulf %30, %30 : vector<5x64xf32>
    %cst_23 = arith.constant dense<0.000000e+00> : vector<5xf32>
    %40 = vector.multi_reduction <add>, %39, %cst_23 [1] : vector<5x64xf32> to vector<5xf32>
    %41 = vector.shape_cast %40 : vector<5xf32> to vector<5x1xf32>
    %cst_24 = arith.constant 6.400000e+01 : f32
    %42 = vector.broadcast %cst_24 : f32 to vector<5x1xf32>
    %43 = arith.divf %41, %42 : vector<5x1xf32>
    %44 = arith.mulf %38, %38 : vector<5x1xf32>
    %45 = arith.subf %43, %44 : vector<5x1xf32>
    %46 = vector.broadcast %38 : vector<5x1xf32> to vector<5x64xf32>
    %47 = arith.subf %30, %46 : vector<5x64xf32>
    %cst_25 = arith.constant 9.99999974E-6 : f32
    %48 = vector.broadcast %cst_25 : f32 to vector<5x1xf32>
    %49 = arith.addf %45, %48 : vector<5x1xf32>
    %50 = math.rsqrt %49 : vector<5x1xf32>
    %51 = vector.broadcast %50 : vector<5x1xf32> to vector<5x64xf32>
    %52 = arith.mulf %47, %51 : vector<5x64xf32>
    %53 = vector.broadcast %32 : vector<1x64xf32> to vector<5x64xf32>
    %54 = arith.mulf %52, %53 : vector<5x64xf32>
    %55 = vector.broadcast %34 : vector<1x64xf32> to vector<5x64xf32>
    %56 = arith.addf %54, %55 : vector<5x64xf32>
    %57 = arith.truncf %56 : vector<5x64xf32> to vector<5x64xbf16>
    %58 = vector.shape_cast %57 : vector<5x64xbf16> to vector<1x5x64xbf16>
    %59 = vector.shape_cast %58 : vector<1x5x64xbf16> to vector<1x5x64xbf16>
    %60 = vector.broadcast %59 : vector<1x5x64xbf16> to vector<4x5x64xbf16>
    %c0_26 = arith.constant 0 : index
    %c0_27 = arith.constant 0 : index
    %c0_28 = arith.constant 0 : index
    %c0_29 = arith.constant 0 : index
    %61 = vector.load %arg8[%c0_26, %c0_27, %c0_28, %c0_29] : memref<2x4x64x16xbf16, #tpu.memory_space<vmem>>, vector<1x4x64x16xbf16>
    %62 = vector.shape_cast %61 : vector<1x4x64x16xbf16> to vector<4x64x16xbf16>
    %cst_30 = arith.constant dense<0.000000e+00> : vector<4x5x16xf32>
    %63 = tpu.matmul %60, %62, %cst_30 {dimension_numbers = #tpu.dot_dimension_numbers<[2], [1], [1], [2], [0, 0, 0, 1, 1, 2], [0], [0]>} : vector<4x5x64xbf16>, vector<4x64x16xbf16>, vector<4x5x16xf32> -> vector<4x5x16xf32>
    %c0_31 = arith.constant 0 : index
    %c0_32 = arith.constant 0 : index
    %c0_33 = arith.constant 0 : index
    %c0_34 = arith.constant 0 : index
    %64 = vector.load %arg11[%c0_31, %c0_32, %c0_33, %c0_34] : memref<2x4x1x16xf32, #tpu.memory_space<vmem>>, vector<1x4x1x16xf32>
    %65 = vector.shape_cast %64 : vector<1x4x1x16xf32> to vector<4x1x16xf32>
    %66 = vector.broadcast %65 : vector<4x1x16xf32> to vector<4x5x16xf32>
    %67 = arith.addf %63, %66 : vector<4x5x16xf32>
    %c0_35 = arith.constant 0 : index
    %c0_36 = arith.constant 0 : index
    %c0_37 = arith.constant 0 : index
    %c0_38 = arith.constant 0 : index
    %68 = vector.load %arg9[%c0_35, %c0_36, %c0_37, %c0_38] : memref<2x4x64x16xbf16, #tpu.memory_space<vmem>>, vector<1x4x64x16xbf16>
    %69 = vector.shape_cast %68 : vector<1x4x64x16xbf16> to vector<4x64x16xbf16>
    %cst_39 = arith.constant dense<0.000000e+00> : vector<4x5x16xf32>
    %70 = tpu.matmul %60, %69, %cst_39 {dimension_numbers = #tpu.dot_dimension_numbers<[2], [1], [1], [2], [0, 0, 0, 1, 1, 2], [0], [0]>} : vector<4x5x64xbf16>, vector<4x64x16xbf16>, vector<4x5x16xf32> -> vector<4x5x16xf32>
    %c0_40 = arith.constant 0 : index
    %c0_41 = arith.constant 0 : index
    %c0_42 = arith.constant 0 : index
    %c0_43 = arith.constant 0 : index
    %71 = vector.load %arg12[%c0_40, %c0_41, %c0_42, %c0_43] : memref<2x4x1x16xf32, #tpu.memory_space<vmem>>, vector<1x4x1x16xf32>
    %72 = vector.shape_cast %71 : vector<1x4x1x16xf32> to vector<4x1x16xf32>
    %73 = vector.broadcast %72 : vector<4x1x16xf32> to vector<4x5x16xf32>
    %74 = arith.addf %70, %73 : vector<4x5x16xf32>
    %c0_44 = arith.constant 0 : index
    %c0_45 = arith.constant 0 : index
    %c0_46 = arith.constant 0 : index
    %c0_47 = arith.constant 0 : index
    %75 = vector.load %arg10[%c0_44, %c0_45, %c0_46, %c0_47] : memref<2x4x64x16xbf16, #tpu.memory_space<vmem>>, vector<1x4x64x16xbf16>
    %76 = vector.shape_cast %75 : vector<1x4x64x16xbf16> to vector<4x64x16xbf16>
    %cst_48 = arith.constant dense<0.000000e+00> : vector<4x5x16xf32>
    %77 = tpu.matmul %60, %76, %cst_48 {dimension_numbers = #tpu.dot_dimension_numbers<[2], [1], [1], [2], [0, 0, 0, 1, 1, 2], [0], [0]>} : vector<4x5x64xbf16>, vector<4x64x16xbf16>, vector<4x5x16xf32> -> vector<4x5x16xf32>
    %c0_49 = arith.constant 0 : index
    %c0_50 = arith.constant 0 : index
    %c0_51 = arith.constant 0 : index
    %c0_52 = arith.constant 0 : index
    %78 = vector.load %arg13[%c0_49, %c0_50, %c0_51, %c0_52] : memref<2x4x1x16xf32, #tpu.memory_space<vmem>>, vector<1x4x1x16xf32>
    %79 = vector.shape_cast %78 : vector<1x4x1x16xf32> to vector<4x1x16xf32>
    %80 = vector.broadcast %79 : vector<4x1x16xf32> to vector<4x5x16xf32>
    %81 = arith.addf %77, %80 : vector<4x5x16xf32>
    %82 = arith.truncf %67 : vector<4x5x16xf32> to vector<4x5x16xbf16>
    %83 = arith.truncf %74 : vector<4x5x16xf32> to vector<4x5x16xbf16>
    %cst_53 = arith.constant dense<0.000000e+00> : vector<4x5x5xf32>
    %84 = tpu.matmul %82, %83, %cst_53 {dimension_numbers = #tpu.dot_dimension_numbers<[2], [2], [1], [1], [0, 0, 0, 1, 1, 1], [0], [0]>} : vector<4x5x16xbf16>, vector<4x5x16xbf16>, vector<4x5x5xf32> -> vector<4x5x5xf32>
    %cst_54 = arith.constant dense<0xFF800000> : vector<4x5xf32>
    %85 = vector.multi_reduction <maximumf>, %84, %cst_54 [2] : vector<4x5x5xf32> to vector<4x5xf32>
    %86 = vector.shape_cast %85 : vector<4x5xf32> to vector<4x5x1xf32>
    %87 = vector.broadcast %86 : vector<4x5x1xf32> to vector<4x5x5xf32>
    %88 = arith.subf %84, %87 : vector<4x5x5xf32>
    %89 = math.exp %88 : vector<4x5x5xf32>
    %cst_55 = arith.constant dense<0.000000e+00> : vector<4x5xf32>
    %90 = vector.multi_reduction <add>, %89, %cst_55 [2] : vector<4x5x5xf32> to vector<4x5xf32>
    %91 = vector.shape_cast %90 : vector<4x5xf32> to vector<4x5x1xf32>
    %92 = tpu.reciprocal %91 {approx = true} : vector<4x5x1xf32> -> vector<4x5x1xf32>
    %93 = vector.broadcast %92 : vector<4x5x1xf32> to vector<4x5x5xf32>
    %94 = arith.mulf %89, %93 : vector<4x5x5xf32>
    %95 = arith.truncf %94 : vector<4x5x5xf32> to vector<4x5x5xbf16>
    %96 = arith.truncf %81 : vector<4x5x16xf32> to vector<4x5x16xbf16>
    %cst_56 = arith.constant dense<0.000000e+00> : vector<4x5x16xf32>
    %97 = tpu.matmul %95, %96, %cst_56 {dimension_numbers = #tpu.dot_dimension_numbers<[2], [1], [1], [2], [0, 0, 0, 1, 1, 2], [0], [0]>} : vector<4x5x5xbf16>, vector<4x5x16xbf16>, vector<4x5x16xf32> -> vector<4x5x16xf32>
    %c0_57 = arith.constant 0 : index
    %c0_58 = arith.constant 0 : index
    %c0_59 = arith.constant 0 : index
    %c0_60 = arith.constant 0 : index
    %98 = vector.load %arg14[%c0_57, %c0_58, %c0_59, %c0_60] : memref<2x4x16x64xbf16, #tpu.memory_space<vmem>>, vector<1x4x16x64xbf16>
    %99 = vector.shape_cast %98 : vector<1x4x16x64xbf16> to vector<4x16x64xbf16>
    %100 = arith.truncf %97 : vector<4x5x16xf32> to vector<4x5x16xbf16>
    %cst_61 = arith.constant dense<0.000000e+00> : vector<4x5x64xf32>
    %101 = tpu.matmul %100, %99, %cst_61 {dimension_numbers = #tpu.dot_dimension_numbers<[2], [1], [1], [2], [0, 0, 0, 1, 1, 2], [0], [0]>} : vector<4x5x16xbf16>, vector<4x16x64xbf16>, vector<4x5x64xf32> -> vector<4x5x64xf32>
    %cst_62 = arith.constant dense<0.000000e+00> : vector<5x64xf32>
    %102 = vector.multi_reduction <add>, %101, %cst_62 [0] : vector<4x5x64xf32> to vector<5x64xf32>
    %103 = arith.addf %30, %102 : vector<5x64xf32>
    %c0_63 = arith.constant 0 : index
    %c0_64 = arith.constant 0 : index
    %c0_65 = arith.constant 0 : index
    %104 = vector.load %arg15[%c0_63, %c0_64, %c0_65] : memref<2x1x64xf32, #tpu.memory_space<vmem>>, vector<1x1x64xf32>
    %105 = vector.shape_cast %104 : vector<1x1x64xf32> to vector<1x64xf32>
    %106 = vector.broadcast %105 : vector<1x64xf32> to vector<5x64xf32>
    %107 = arith.addf %103, %106 : vector<5x64xf32>
    %c0_66 = arith.constant 0 : index
    %c0_67 = arith.constant 0 : index
    %c0_68 = arith.constant 0 : index
    %108 = vector.load %arg16[%c0_66, %c0_67, %c0_68] : memref<2x1x64xf32, #tpu.memory_space<vmem>>, vector<1x1x64xf32>
    %109 = vector.shape_cast %108 : vector<1x1x64xf32> to vector<1x64xf32>
    %c0_69 = arith.constant 0 : index
    %c0_70 = arith.constant 0 : index
    %c0_71 = arith.constant 0 : index
    %110 = vector.load %arg17[%c0_69, %c0_70, %c0_71] : memref<2x1x64xf32, #tpu.memory_space<vmem>>, vector<1x1x64xf32>
    %111 = vector.shape_cast %110 : vector<1x1x64xf32> to vector<1x64xf32>
    %cst_72 = arith.constant dense<0.000000e+00> : vector<5xf32>
    %112 = vector.multi_reduction <add>, %107, %cst_72 [1] : vector<5x64xf32> to vector<5xf32>
    %113 = vector.shape_cast %112 : vector<5xf32> to vector<5x1xf32>
    %cst_73 = arith.constant 6.400000e+01 : f32
    %114 = vector.broadcast %cst_73 : f32 to vector<5x1xf32>
    %115 = arith.divf %113, %114 : vector<5x1xf32>
    %116 = arith.mulf %107, %107 : vector<5x64xf32>
    %cst_74 = arith.constant dense<0.000000e+00> : vector<5xf32>
    %117 = vector.multi_reduction <add>, %116, %cst_74 [1] : vector<5x64xf32> to vector<5xf32>
    %118 = vector.shape_cast %117 : vector<5xf32> to vector<5x1xf32>
    %cst_75 = arith.constant 6.400000e+01 : f32
    %119 = vector.broadcast %cst_75 : f32 to vector<5x1xf32>
    %120 = arith.divf %118, %119 : vector<5x1xf32>
    %121 = arith.mulf %115, %115 : vector<5x1xf32>
    %122 = arith.subf %120, %121 : vector<5x1xf32>
    %123 = vector.broadcast %115 : vector<5x1xf32> to vector<5x64xf32>
    %124 = arith.subf %107, %123 : vector<5x64xf32>
    %cst_76 = arith.constant 9.99999974E-6 : f32
    %125 = vector.broadcast %cst_76 : f32 to vector<5x1xf32>
    %126 = arith.addf %122, %125 : vector<5x1xf32>
    %127 = math.rsqrt %126 : vector<5x1xf32>
    %128 = vector.broadcast %127 : vector<5x1xf32> to vector<5x64xf32>
    %129 = arith.mulf %124, %128 : vector<5x64xf32>
    %130 = vector.broadcast %109 : vector<1x64xf32> to vector<5x64xf32>
    %131 = arith.mulf %129, %130 : vector<5x64xf32>
    %132 = vector.broadcast %111 : vector<1x64xf32> to vector<5x64xf32>
    %133 = arith.addf %131, %132 : vector<5x64xf32>
    %134 = arith.truncf %133 : vector<5x64xf32> to vector<5x64xbf16>
    %c0_77 = arith.constant 0 : index
    %c0_78 = arith.constant 0 : index
    %c0_79 = arith.constant 0 : index
    %135 = vector.load %arg18[%c0_77, %c0_78, %c0_79] : memref<2x64x256xbf16, #tpu.memory_space<vmem>>, vector<1x64x256xbf16>
    %136 = vector.shape_cast %135 : vector<1x64x256xbf16> to vector<64x256xbf16>
    %cst_80 = arith.constant dense<0.000000e+00> : vector<5x256xf32>
    %137 = tpu.matmul %134, %136, %cst_80 {dimension_numbers = #tpu.dot_dimension_numbers<[1], [0], [0], [1], [0, 0, 1, 1], [], []>} : vector<5x64xbf16>, vector<64x256xbf16>, vector<5x256xf32> -> vector<5x256xf32>
    %c0_81 = arith.constant 0 : index
    %c0_82 = arith.constant 0 : index
    %c0_83 = arith.constant 0 : index
    %138 = vector.load %arg19[%c0_81, %c0_82, %c0_83] : memref<2x1x256xf32, #tpu.memory_space<vmem>>, vector<1x1x256xf32>
    %139 = vector.shape_cast %138 : vector<1x1x256xf32> to vector<1x256xf32>
    %140 = vector.broadcast %139 : vector<1x256xf32> to vector<5x256xf32>
    %141 = arith.addf %137, %140 : vector<5x256xf32>
    %cst_84 = arith.constant 1.702000e+00 : f32
    %142 = vector.broadcast %cst_84 : f32 to vector<5x256xf32>
    %143 = arith.mulf %142, %141 : vector<5x256xf32>
    %144 = arith.negf %143 : vector<5x256xf32>
    %145 = math.exp %144 : vector<5x256xf32>
    %cst_85 = arith.constant 1.000000e+00 : f32
    %146 = vector.broadcast %cst_85 : f32 to vector<5x256xf32>
    %147 = arith.addf %146, %145 : vector<5x256xf32>
    %148 = arith.divf %146, %147 : vector<5x256xf32>
    %149 = arith.mulf %141, %148 : vector<5x256xf32>
    %150 = arith.truncf %149 : vector<5x256xf32> to vector<5x256xbf16>
    %c0_86 = arith.constant 0 : index
    %c0_87 = arith.constant 0 : index
    %c0_88 = arith.constant 0 : index
    %151 = vector.load %arg20[%c0_86, %c0_87, %c0_88] : memref<2x256x64xbf16, #tpu.memory_space<vmem>>, vector<1x256x64xbf16>
    %152 = vector.shape_cast %151 : vector<1x256x64xbf16> to vector<256x64xbf16>
    %cst_89 = arith.constant dense<0.000000e+00> : vector<5x64xf32>
    %153 = tpu.matmul %150, %152, %cst_89 {dimension_numbers = #tpu.dot_dimension_numbers<[1], [0], [0], [1], [0, 0, 1, 1], [], []>} : vector<5x256xbf16>, vector<256x64xbf16>, vector<5x64xf32> -> vector<5x64xf32>
    %154 = arith.addf %107, %153 : vector<5x64xf32>
    %c0_90 = arith.constant 0 : index
    %c0_91 = arith.constant 0 : index
    %c0_92 = arith.constant 0 : index
    %155 = vector.load %arg21[%c0_90, %c0_91, %c0_92] : memref<2x1x64xf32, #tpu.memory_space<vmem>>, vector<1x1x64xf32>
    %156 = vector.shape_cast %155 : vector<1x1x64xf32> to vector<1x64xf32>
    %157 = vector.broadcast %156 : vector<1x64xf32> to vector<5x64xf32>
    %158 = arith.addf %154, %157 : vector<5x64xf32>
    %c1 = arith.constant 1 : index
    %c0_93 = arith.constant 0 : index
    %c0_94 = arith.constant 0 : index
    %159 = vector.load %arg6[%c1, %c0_93, %c0_94] : memref<2x1x64xf32, #tpu.memory_space<vmem>>, vector<1x1x64xf32>
    %160 = vector.shape_cast %159 : vector<1x1x64xf32> to vector<1x64xf32>
    %c1_95 = arith.constant 1 : index
    %c0_96 = arith.constant 0 : index
    %c0_97 = arith.constant 0 : index
    %161 = vector.load %arg7[%c1_95, %c0_96, %c0_97] : memref<2x1x64xf32, #tpu.memory_space<vmem>>, vector<1x1x64xf32>
    %162 = vector.shape_cast %161 : vector<1x1x64xf32> to vector<1x64xf32>
    %cst_98 = arith.constant dense<0.000000e+00> : vector<5xf32>
    %163 = vector.multi_reduction <add>, %158, %cst_98 [1] : vector<5x64xf32> to vector<5xf32>
    %164 = vector.shape_cast %163 : vector<5xf32> to vector<5x1xf32>
    %cst_99 = arith.constant 6.400000e+01 : f32
    %165 = vector.broadcast %cst_99 : f32 to vector<5x1xf32>
    %166 = arith.divf %164, %165 : vector<5x1xf32>
    %167 = arith.mulf %158, %158 : vector<5x64xf32>
    %cst_100 = arith.constant dense<0.000000e+00> : vector<5xf32>
    %168 = vector.multi_reduction <add>, %167, %cst_100 [1] : vector<5x64xf32> to vector<5xf32>
    %169 = vector.shape_cast %168 : vector<5xf32> to vector<5x1xf32>
    %cst_101 = arith.constant 6.400000e+01 : f32
    %170 = vector.broadcast %cst_101 : f32 to vector<5x1xf32>
    %171 = arith.divf %169, %170 : vector<5x1xf32>
    %172 = arith.mulf %166, %166 : vector<5x1xf32>
    %173 = arith.subf %171, %172 : vector<5x1xf32>
    %174 = vector.broadcast %166 : vector<5x1xf32> to vector<5x64xf32>
    %175 = arith.subf %158, %174 : vector<5x64xf32>
    %cst_102 = arith.constant 9.99999974E-6 : f32
    %176 = vector.broadcast %cst_102 : f32 to vector<5x1xf32>
    %177 = arith.addf %173, %176 : vector<5x1xf32>
    %178 = math.rsqrt %177 : vector<5x1xf32>
    %179 = vector.broadcast %178 : vector<5x1xf32> to vector<5x64xf32>
    %180 = arith.mulf %175, %179 : vector<5x64xf32>
    %181 = vector.broadcast %160 : vector<1x64xf32> to vector<5x64xf32>
    %182 = arith.mulf %180, %181 : vector<5x64xf32>
    %183 = vector.broadcast %162 : vector<1x64xf32> to vector<5x64xf32>
    %184 = arith.addf %182, %183 : vector<5x64xf32>
    %185 = arith.truncf %184 : vector<5x64xf32> to vector<5x64xbf16>
    %186 = vector.shape_cast %185 : vector<5x64xbf16> to vector<1x5x64xbf16>
    %187 = vector.shape_cast %186 : vector<1x5x64xbf16> to vector<1x5x64xbf16>
    %188 = vector.broadcast %187 : vector<1x5x64xbf16> to vector<4x5x64xbf16>
    %c1_103 = arith.constant 1 : index
    %c0_104 = arith.constant 0 : index
    %c0_105 = arith.constant 0 : index
    %c0_106 = arith.constant 0 : index
    %189 = vector.load %arg8[%c1_103, %c0_104, %c0_105, %c0_106] : memref<2x4x64x16xbf16, #tpu.memory_space<vmem>>, vector<1x4x64x16xbf16>
    %190 = vector.shape_cast %189 : vector<1x4x64x16xbf16> to vector<4x64x16xbf16>
    %cst_107 = arith.constant dense<0.000000e+00> : vector<4x5x16xf32>
    %191 = tpu.matmul %188, %190, %cst_107 {dimension_numbers = #tpu.dot_dimension_numbers<[2], [1], [1], [2], [0, 0, 0, 1, 1, 2], [0], [0]>} : vector<4x5x64xbf16>, vector<4x64x16xbf16>, vector<4x5x16xf32> -> vector<4x5x16xf32>
    %c1_108 = arith.constant 1 : index
    %c0_109 = arith.constant 0 : index
    %c0_110 = arith.constant 0 : index
    %c0_111 = arith.constant 0 : index
    %192 = vector.load %arg11[%c1_108, %c0_109, %c0_110, %c0_111] : memref<2x4x1x16xf32, #tpu.memory_space<vmem>>, vector<1x4x1x16xf32>
    %193 = vector.shape_cast %192 : vector<1x4x1x16xf32> to vector<4x1x16xf32>
    %194 = vector.broadcast %193 : vector<4x1x16xf32> to vector<4x5x16xf32>
    %195 = arith.addf %191, %194 : vector<4x5x16xf32>
    %c1_112 = arith.constant 1 : index
    %c0_113 = arith.constant 0 : index
    %c0_114 = arith.constant 0 : index
    %c0_115 = arith.constant 0 : index
    %196 = vector.load %arg9[%c1_112, %c0_113, %c0_114, %c0_115] : memref<2x4x64x16xbf16, #tpu.memory_space<vmem>>, vector<1x4x64x16xbf16>
    %197 = vector.shape_cast %196 : vector<1x4x64x16xbf16> to vector<4x64x16xbf16>
    %cst_116 = arith.constant dense<0.000000e+00> : vector<4x5x16xf32>
    %198 = tpu.matmul %188, %197, %cst_116 {dimension_numbers = #tpu.dot_dimension_numbers<[2], [1], [1], [2], [0, 0, 0, 1, 1, 2], [0], [0]>} : vector<4x5x64xbf16>, vector<4x64x16xbf16>, vector<4x5x16xf32> -> vector<4x5x16xf32>
    %c1_117 = arith.constant 1 : index
    %c0_118 = arith.constant 0 : index
    %c0_119 = arith.constant 0 : index
    %c0_120 = arith.constant 0 : index
    %199 = vector.load %arg12[%c1_117, %c0_118, %c0_119, %c0_120] : memref<2x4x1x16xf32, #tpu.memory_space<vmem>>, vector<1x4x1x16xf32>
    %200 = vector.shape_cast %199 : vector<1x4x1x16xf32> to vector<4x1x16xf32>
    %201 = vector.broadcast %200 : vector<4x1x16xf32> to vector<4x5x16xf32>
    %202 = arith.addf %198, %201 : vector<4x5x16xf32>
    %c1_121 = arith.constant 1 : index
    %c0_122 = arith.constant 0 : index
    %c0_123 = arith.constant 0 : index
    %c0_124 = arith.constant 0 : index
    %203 = vector.load %arg10[%c1_121, %c0_122, %c0_123, %c0_124] : memref<2x4x64x16xbf16, #tpu.memory_space<vmem>>, vector<1x4x64x16xbf16>
    %204 = vector.shape_cast %203 : vector<1x4x64x16xbf16> to vector<4x64x16xbf16>
    %cst_125 = arith.constant dense<0.000000e+00> : vector<4x5x16xf32>
    %205 = tpu.matmul %188, %204, %cst_125 {dimension_numbers = #tpu.dot_dimension_numbers<[2], [1], [1], [2], [0, 0, 0, 1, 1, 2], [0], [0]>} : vector<4x5x64xbf16>, vector<4x64x16xbf16>, vector<4x5x16xf32> -> vector<4x5x16xf32>
    %c1_126 = arith.constant 1 : index
    %c0_127 = arith.constant 0 : index
    %c0_128 = arith.constant 0 : index
    %c0_129 = arith.constant 0 : index
    %206 = vector.load %arg13[%c1_126, %c0_127, %c0_128, %c0_129] : memref<2x4x1x16xf32, #tpu.memory_space<vmem>>, vector<1x4x1x16xf32>
    %207 = vector.shape_cast %206 : vector<1x4x1x16xf32> to vector<4x1x16xf32>
    %208 = vector.broadcast %207 : vector<4x1x16xf32> to vector<4x5x16xf32>
    %209 = arith.addf %205, %208 : vector<4x5x16xf32>
    %210 = arith.truncf %195 : vector<4x5x16xf32> to vector<4x5x16xbf16>
    %211 = arith.truncf %202 : vector<4x5x16xf32> to vector<4x5x16xbf16>
    %cst_130 = arith.constant dense<0.000000e+00> : vector<4x5x5xf32>
    %212 = tpu.matmul %210, %211, %cst_130 {dimension_numbers = #tpu.dot_dimension_numbers<[2], [2], [1], [1], [0, 0, 0, 1, 1, 1], [0], [0]>} : vector<4x5x16xbf16>, vector<4x5x16xbf16>, vector<4x5x5xf32> -> vector<4x5x5xf32>
    %cst_131 = arith.constant dense<0xFF800000> : vector<4x5xf32>
    %213 = vector.multi_reduction <maximumf>, %212, %cst_131 [2] : vector<4x5x5xf32> to vector<4x5xf32>
    %214 = vector.shape_cast %213 : vector<4x5xf32> to vector<4x5x1xf32>
    %215 = vector.broadcast %214 : vector<4x5x1xf32> to vector<4x5x5xf32>
    %216 = arith.subf %212, %215 : vector<4x5x5xf32>
    %217 = math.exp %216 : vector<4x5x5xf32>
    %cst_132 = arith.constant dense<0.000000e+00> : vector<4x5xf32>
    %218 = vector.multi_reduction <add>, %217, %cst_132 [2] : vector<4x5x5xf32> to vector<4x5xf32>
    %219 = vector.shape_cast %218 : vector<4x5xf32> to vector<4x5x1xf32>
    %220 = tpu.reciprocal %219 {approx = true} : vector<4x5x1xf32> -> vector<4x5x1xf32>
    %221 = vector.broadcast %220 : vector<4x5x1xf32> to vector<4x5x5xf32>
    %222 = arith.mulf %217, %221 : vector<4x5x5xf32>
    %223 = arith.truncf %222 : vector<4x5x5xf32> to vector<4x5x5xbf16>
    %224 = arith.truncf %209 : vector<4x5x16xf32> to vector<4x5x16xbf16>
    %cst_133 = arith.constant dense<0.000000e+00> : vector<4x5x16xf32>
    %225 = tpu.matmul %223, %224, %cst_133 {dimension_numbers = #tpu.dot_dimension_numbers<[2], [1], [1], [2], [0, 0, 0, 1, 1, 2], [0], [0]>} : vector<4x5x5xbf16>, vector<4x5x16xbf16>, vector<4x5x16xf32> -> vector<4x5x16xf32>
    %c1_134 = arith.constant 1 : index
    %c0_135 = arith.constant 0 : index
    %c0_136 = arith.constant 0 : index
    %c0_137 = arith.constant 0 : index
    %226 = vector.load %arg14[%c1_134, %c0_135, %c0_136, %c0_137] : memref<2x4x16x64xbf16, #tpu.memory_space<vmem>>, vector<1x4x16x64xbf16>
    %227 = vector.shape_cast %226 : vector<1x4x16x64xbf16> to vector<4x16x64xbf16>
    %228 = arith.truncf %225 : vector<4x5x16xf32> to vector<4x5x16xbf16>
    %cst_138 = arith.constant dense<0.000000e+00> : vector<4x5x64xf32>
    %229 = tpu.matmul %228, %227, %cst_138 {dimension_numbers = #tpu.dot_dimension_numbers<[2], [1], [1], [2], [0, 0, 0, 1, 1, 2], [0], [0]>} : vector<4x5x16xbf16>, vector<4x16x64xbf16>, vector<4x5x64xf32> -> vector<4x5x64xf32>
    %cst_139 = arith.constant dense<0.000000e+00> : vector<5x64xf32>
    %230 = vector.multi_reduction <add>, %229, %cst_139 [0] : vector<4x5x64xf32> to vector<5x64xf32>
    %231 = arith.addf %158, %230 : vector<5x64xf32>
    %c1_140 = arith.constant 1 : index
    %c0_141 = arith.constant 0 : index
    %c0_142 = arith.constant 0 : index
    %232 = vector.load %arg15[%c1_140, %c0_141, %c0_142] : memref<2x1x64xf32, #tpu.memory_space<vmem>>, vector<1x1x64xf32>
    %233 = vector.shape_cast %232 : vector<1x1x64xf32> to vector<1x64xf32>
    %234 = vector.broadcast %233 : vector<1x64xf32> to vector<5x64xf32>
    %235 = arith.addf %231, %234 : vector<5x64xf32>
    %c1_143 = arith.constant 1 : index
    %c0_144 = arith.constant 0 : index
    %c0_145 = arith.constant 0 : index
    %236 = vector.load %arg16[%c1_143, %c0_144, %c0_145] : memref<2x1x64xf32, #tpu.memory_space<vmem>>, vector<1x1x64xf32>
    %237 = vector.shape_cast %236 : vector<1x1x64xf32> to vector<1x64xf32>
    %c1_146 = arith.constant 1 : index
    %c0_147 = arith.constant 0 : index
    %c0_148 = arith.constant 0 : index
    %238 = vector.load %arg17[%c1_146, %c0_147, %c0_148] : memref<2x1x64xf32, #tpu.memory_space<vmem>>, vector<1x1x64xf32>
    %239 = vector.shape_cast %238 : vector<1x1x64xf32> to vector<1x64xf32>
    %cst_149 = arith.constant dense<0.000000e+00> : vector<5xf32>
    %240 = vector.multi_reduction <add>, %235, %cst_149 [1] : vector<5x64xf32> to vector<5xf32>
    %241 = vector.shape_cast %240 : vector<5xf32> to vector<5x1xf32>
    %cst_150 = arith.constant 6.400000e+01 : f32
    %242 = vector.broadcast %cst_150 : f32 to vector<5x1xf32>
    %243 = arith.divf %241, %242 : vector<5x1xf32>
    %244 = arith.mulf %235, %235 : vector<5x64xf32>
    %cst_151 = arith.constant dense<0.000000e+00> : vector<5xf32>
    %245 = vector.multi_reduction <add>, %244, %cst_151 [1] : vector<5x64xf32> to vector<5xf32>
    %246 = vector.shape_cast %245 : vector<5xf32> to vector<5x1xf32>
    %cst_152 = arith.constant 6.400000e+01 : f32
    %247 = vector.broadcast %cst_152 : f32 to vector<5x1xf32>
    %248 = arith.divf %246, %247 : vector<5x1xf32>
    %249 = arith.mulf %243, %243 : vector<5x1xf32>
    %250 = arith.subf %248, %249 : vector<5x1xf32>
    %251 = vector.broadcast %243 : vector<5x1xf32> to vector<5x64xf32>
    %252 = arith.subf %235, %251 : vector<5x64xf32>
    %cst_153 = arith.constant 9.99999974E-6 : f32
    %253 = vector.broadcast %cst_153 : f32 to vector<5x1xf32>
    %254 = arith.addf %250, %253 : vector<5x1xf32>
    %255 = math.rsqrt %254 : vector<5x1xf32>
    %256 = vector.broadcast %255 : vector<5x1xf32> to vector<5x64xf32>
    %257 = arith.mulf %252, %256 : vector<5x64xf32>
    %258 = vector.broadcast %237 : vector<1x64xf32> to vector<5x64xf32>
    %259 = arith.mulf %257, %258 : vector<5x64xf32>
    %260 = vector.broadcast %239 : vector<1x64xf32> to vector<5x64xf32>
    %261 = arith.addf %259, %260 : vector<5x64xf32>
    %262 = arith.truncf %261 : vector<5x64xf32> to vector<5x64xbf16>
    %c1_154 = arith.constant 1 : index
    %c0_155 = arith.constant 0 : index
    %c0_156 = arith.constant 0 : index
    %263 = vector.load %arg18[%c1_154, %c0_155, %c0_156] : memref<2x64x256xbf16, #tpu.memory_space<vmem>>, vector<1x64x256xbf16>
    %264 = vector.shape_cast %263 : vector<1x64x256xbf16> to vector<64x256xbf16>
    %cst_157 = arith.constant dense<0.000000e+00> : vector<5x256xf32>
    %265 = tpu.matmul %262, %264, %cst_157 {dimension_numbers = #tpu.dot_dimension_numbers<[1], [0], [0], [1], [0, 0, 1, 1], [], []>} : vector<5x64xbf16>, vector<64x256xbf16>, vector<5x256xf32> -> vector<5x256xf32>
    %c1_158 = arith.constant 1 : index
    %c0_159 = arith.constant 0 : index
    %c0_160 = arith.constant 0 : index
    %266 = vector.load %arg19[%c1_158, %c0_159, %c0_160] : memref<2x1x256xf32, #tpu.memory_space<vmem>>, vector<1x1x256xf32>
    %267 = vector.shape_cast %266 : vector<1x1x256xf32> to vector<1x256xf32>
    %268 = vector.broadcast %267 : vector<1x256xf32> to vector<5x256xf32>
    %269 = arith.addf %265, %268 : vector<5x256xf32>
    %cst_161 = arith.constant 1.702000e+00 : f32
    %270 = vector.broadcast %cst_161 : f32 to vector<5x256xf32>
    %271 = arith.mulf %270, %269 : vector<5x256xf32>
    %272 = arith.negf %271 : vector<5x256xf32>
    %273 = math.exp %272 : vector<5x256xf32>
    %cst_162 = arith.constant 1.000000e+00 : f32
    %274 = vector.broadcast %cst_162 : f32 to vector<5x256xf32>
    %275 = arith.addf %274, %273 : vector<5x256xf32>
    %276 = arith.divf %274, %275 : vector<5x256xf32>
    %277 = arith.mulf %269, %276 : vector<5x256xf32>
    %278 = arith.truncf %277 : vector<5x256xf32> to vector<5x256xbf16>
    %c1_163 = arith.constant 1 : index
    %c0_164 = arith.constant 0 : index
    %c0_165 = arith.constant 0 : index
    %279 = vector.load %arg20[%c1_163, %c0_164, %c0_165] : memref<2x256x64xbf16, #tpu.memory_space<vmem>>, vector<1x256x64xbf16>
    %280 = vector.shape_cast %279 : vector<1x256x64xbf16> to vector<256x64xbf16>
    %cst_166 = arith.constant dense<0.000000e+00> : vector<5x64xf32>
    %281 = tpu.matmul %278, %280, %cst_166 {dimension_numbers = #tpu.dot_dimension_numbers<[1], [0], [0], [1], [0, 0, 1, 1], [], []>} : vector<5x256xbf16>, vector<256x64xbf16>, vector<5x64xf32> -> vector<5x64xf32>
    %282 = arith.addf %235, %281 : vector<5x64xf32>
    %c1_167 = arith.constant 1 : index
    %c0_168 = arith.constant 0 : index
    %c0_169 = arith.constant 0 : index
    %283 = vector.load %arg21[%c1_167, %c0_168, %c0_169] : memref<2x1x64xf32, #tpu.memory_space<vmem>>, vector<1x1x64xf32>
    %284 = vector.shape_cast %283 : vector<1x1x64xf32> to vector<1x64xf32>
    %285 = vector.broadcast %284 : vector<1x64xf32> to vector<5x64xf32>
    %286 = arith.addf %282, %285 : vector<5x64xf32>
    %c0_170 = arith.constant 0 : index
    %c0_171 = arith.constant 0 : index
    %c0_172 = arith.constant 0 : index
    %287 = vector.load %arg22[%c0_170, %c0_171, %c0_172] : memref<1x5x64xf32, #tpu.memory_space<vmem>>, vector<1x5x64xf32>
    %288 = vector.shape_cast %287 : vector<1x5x64xf32> to vector<5x64xf32>
    %289 = vector.shape_cast %286 : vector<5x64xf32> to vector<1x5x64xf32>
    tpu.vector_store %arg22[%c0_170, %c0_171, %c0_172], %289 {strides = array<i32>} : memref<1x5x64xf32, #tpu.memory_space<vmem>>, vector<1x5x64xf32>,
    return
  }
  func.func @transform_0(%arg0: i32) -> (i32, i32, i32) {
    %c0_i32 = arith.constant 0 : i32
    %c0_i32_0 = arith.constant 0 : i32
    %c0_i32_1 = arith.constant 0 : i32
    return %arg0, %c0_i32, %c0_i32_0 : i32, i32, i32
  }
  func.func @transform_1(%arg0: i32) -> (i32, i32) {
    %c0_i32 = arith.constant 0 : i32
    %c0_i32_0 = arith.constant 0 : i32
    %c0_i32_1 = arith.constant 0 : i32
    return %c0_i32, %c0_i32_0 : i32, i32
  }
  func.func @transform_2(%arg0: i32) -> (i32, i32) {
    %c0_i32 = arith.constant 0 : i32
    %c0_i32_0 = arith.constant 0 : i32
    %c0_i32_1 = arith.constant 0 : i32
    return %c0_i32, %c0_i32_0 : i32, i32
  }
  func.func @transform_3(%arg0: i32) -> (i32, i32) {
    %c0_i32 = arith.constant 0 : i32
    %c0_i32_0 = arith.constant 0 : i32
    %c0_i32_1 = arith.constant 0 : i32
    return %c0_i32, %c0_i32_0 : i32, i32
  }
  func.func @transform_4(%arg0: i32) -> (i32, i32) {
    %c0_i32 = arith.constant 0 : i32
    %c0_i32_0 = arith.constant 0 : i32
    %c0_i32_1 = arith.constant 0 : i32
    return %c0_i32, %c0_i32_0 : i32, i32
  }
  func.func @transform_5(%arg0: i32) -> (i32, i32, i32) {
    %c0_i32 = arith.constant 0 : i32
    %c0_i32_0 = arith.constant 0 : i32
    %c0_i32_1 = arith.constant 0 : i32
    %c0_i32_2 = arith.constant 0 : i32
    return %c0_i32, %c0_i32_0, %c0_i32_1 : i32, i32, i32
  }
  func.func @transform_6(%arg0: i32) -> (i32, i32, i32) {
    %c0_i32 = arith.constant 0 : i32
    %c0_i32_0 = arith.constant 0 : i32
    %c0_i32_1 = arith.constant 0 : i32
    %c0_i32_2 = arith.constant 0 : i32
    return %c0_i32, %c0_i32_0, %c0_i32_1 : i32, i32, i32
  }
  func.func @transform_7(%arg0: i32) -> (i32, i32, i32, i32) {
    %c0_i32 = arith.constant 0 : i32
    %c0_i32_0 = arith.constant 0 : i32
    %c0_i32_1 = arith.constant 0 : i32
    %c0_i32_2 = arith.constant 0 : i32
    %c0_i32_3 = arith.constant 0 : i32
    return %c0_i32, %c0_i32_0, %c0_i32_1, %c0_i32_2 : i32, i32, i32, i32
  }
  func.func @transform_8(%arg0: i32) -> (i32, i32, i32, i32) {
    %c0_i32 = arith.constant 0 : i32
    %c0_i32_0 = arith.constant 0 : i32
    %c0_i32_1 = arith.constant 0 : i32
    %c0_i32_2 = arith.constant 0 : i32
    %c0_i32_3 = arith.constant 0 : i32
    return %c0_i32, %c0_i32_0, %c0_i32_1, %c0_i32_2 : i32, i32, i32, i32
  }
  func.func @transform_9(%arg0: i32) -> (i32, i32, i32, i32) {
    %c0_i32 = arith.constant 0 : i32
    %c0_i32_0 = arith.constant 0 : i32
    %c0_i32_1 = arith.constant 0 : i32
    %c0_i32_2 = arith.constant 0 : i32
    %c0_i32_3 = arith.constant 0 : i32
    return %c0_i32, %c0_i32_0, %c0_i32_1, %c0_i32_2 : i32, i32, i32, i32
  }
  func.func @transform_10(%arg0: i32) -> (i32, i32, i32, i32) {
    %c0_i32 = arith.constant 0 : i32
    %c0_i32_0 = arith.constant 0 : i32
    %c0_i32_1 = arith.constant 0 : i32
    %c0_i32_2 = arith.constant 0 : i32
    %c0_i32_3 = arith.constant 0 : i32
    return %c0_i32, %c0_i32_0, %c0_i32_1, %c0_i32_2 : i32, i32, i32, i32
  }
  func.func @transform_11(%arg0: i32) -> (i32, i32, i32, i32) {
    %c0_i32 = arith.constant 0 : i32
    %c0_i32_0 = arith.constant 0 : i32
    %c0_i32_1 = arith.constant 0 : i32
    %c0_i32_2 = arith.constant 0 : i32
    %c0_i32_3 = arith.constant 0 : i32
    return %c0_i32, %c0_i32_0, %c0_i32_1, %c0_i32_2 : i32, i32, i32, i32
  }
  func.func @transform_12(%arg0: i32) -> (i32, i32, i32, i32) {
    %c0_i32 = arith.constant 0 : i32
    %c0_i32_0 = arith.constant 0 : i32
    %c0_i32_1 = arith.constant 0 : i32
    %c0_i32_2 = arith.constant 0 : i32
    %c0_i32_3 = arith.constant 0 : i32
    return %c0_i32, %c0_i32_0, %c0_i32_1, %c0_i32_2 : i32, i32, i32, i32
  }
  func.func @transform_13(%arg0: i32) -> (i32, i32, i32, i32) {
    %c0_i32 = arith.constant 0 : i32
    %c0_i32_0 = arith.constant 0 : i32
    %c0_i32_1 = arith.constant 0 : i32
    %c0_i32_2 = arith.constant 0 : i32
    %c0_i32_3 = arith.constant 0 : i32
    return %c0_i32, %c0_i32_0, %c0_i32_1, %c0_i32_2 : i32, i32, i32, i32
  }
  func.func @transform_14(%arg0: i32) -> (i32, i32, i32) {
    %c0_i32 = arith.constant 0 : i32
    %c0_i32_0 = arith.constant 0 : i32
    %c0_i32_1 = arith.constant 0 : i32
    %c0_i32_2 = arith.constant 0 : i32
    return %c0_i32, %c0_i32_0, %c0_i32_1 : i32, i32, i32
  }
  func.func @transform_15(%arg0: i32) -> (i32, i32, i32) {
    %c0_i32 = arith.constant 0 : i32
    %c0_i32_0 = arith.constant 0 : i32
    %c0_i32_1 = arith.constant 0 : i32
    %c0_i32_2 = arith.constant 0 : i32
    return %c0_i32, %c0_i32_0, %c0_i32_1 : i32, i32, i32
  }
  func.func @transform_16(%arg0: i32) -> (i32, i32, i32) {
    %c0_i32 = arith.constant 0 : i32
    %c0_i32_0 = arith.constant 0 : i32
    %c0_i32_1 = arith.constant 0 : i32
    %c0_i32_2 = arith.constant 0 : i32
    return %c0_i32, %c0_i32_0, %c0_i32_1 : i32, i32, i32
  }
  func.func @transform_17(%arg0: i32) -> (i32, i32, i32) {
    %c0_i32 = arith.constant 0 : i32
    %c0_i32_0 = arith.constant 0 : i32
    %c0_i32_1 = arith.constant 0 : i32
    %c0_i32_2 = arith.constant 0 : i32
    return %c0_i32, %c0_i32_0, %c0_i32_1 : i32, i32, i32
  }
  func.func @transform_18(%arg0: i32) -> (i32, i32, i32) {
    %c0_i32 = arith.constant 0 : i32
    %c0_i32_0 = arith.constant 0 : i32
    %c0_i32_1 = arith.constant 0 : i32
    %c0_i32_2 = arith.constant 0 : i32
    return %c0_i32, %c0_i32_0, %c0_i32_1 : i32, i32, i32
  }
  func.func @transform_19(%arg0: i32) -> (i32, i32, i32) {
    %c0_i32 = arith.constant 0 : i32
    %c0_i32_0 = arith.constant 0 : i32
    %c0_i32_1 = arith.constant 0 : i32
    %c0_i32_2 = arith.constant 0 : i32
    return %c0_i32, %c0_i32_0, %c0_i32_1 : i32, i32, i32
  }
  func.func @transform_20(%arg0: i32) -> (i32, i32, i32) {
    %c0_i32 = arith.constant 0 : i32
    %c0_i32_0 = arith.constant 0 : i32
    %c0_i32_1 = arith.constant 0 : i32
    %c0_i32_2 = arith.constant 0 : i32
    return %c0_i32, %c0_i32_0, %c0_i32_1 : i32, i32, i32
  }
  func.func @transform_21(%arg0: i32) -> (i32, i32, i32) {
    %c0_i32 = arith.constant 0 : i32
    %c0_i32_0 = arith.constant 0 : i32
    %c0_i32_1 = arith.constant 0 : i32
    return %arg0, %c0_i32, %c0_i32_0 : i32, i32, i32
  }
}

</mosaic_0001>

<bundles_post_ra>
// kernel: pubmed_clip_vit_forward.1
= control target key start
LH: loop header
LB: loop body
LE: loop exit
PB: predicated region body
PF: predicated region fallthrough
CT: control target
= control target key end

     0   :  { %s7339_s0 = inlined_call_operand.vmem [shape: f32[2,5,192], index: 0, kind: input, shape index: {}]   ;;  %s7340_s1 = inlined_call_operand.vmem [shape: bf16[192,64], index: 1, kind: input, shape index: {}]   ;;  %s7341_s2 = inlined_call_operand.vmem [shape: f32[5,64], index: 2, kind: input, shape index: {}]   ;;  %s7342_s3 = inlined_call_operand.vmem [shape: f32[1,64], index: 3, kind: input, shape index: {}]   ;;  %s7343_s4 = inlined_call_operand.vmem [shape: f32[1,64], index: 4, kind: input, shape index: {}]   ;;  %s7344_s5 = inlined_call_operand.vmem [shape: f32[2,1,64], index: 5, kind: input, shape index: {}]   ;;  %s7345_s6 = inlined_call_operand.vmem [shape: f32[2,1,64], index: 6, kind: input, shape index: {}]   ;;  %s7346_s7 = inlined_call_operand.vmem [shape: bf16[2,4,64,16], index: 7, kind: input, shape index: {}]   ;;  %s7347_s8 = inlined_call_operand.vmem [shape: bf16[2,4,64,16], index: 8, kind: input, shape index: {}]   ;;  %s7348_s9 = inlined_call_operand.vmem [shape: bf16[2,4,64,16], index: 9, kind: input, shape index: {}]   ;;  %s7349_s10 = inlined_call_operand.vmem [shape: f32[2,4,1,16], index: 10, kind: input, shape index: {}]   ;;  %s7350_s11 = inlined_call_operand.vmem [shape: f32[2,4,1,16], index: 11, kind: input, shape index: {}]   ;;  %s7351_s12 = inlined_call_operand.vmem [shape: f32[2,4,1,16], index: 12, kind: input, shape index: {}]   ;;  %s7352_s13 = inlined_call_operand.vmem [shape: bf16[2,4,16,64], index: 13, kind: input, shape index: {}]   ;;  %s7353_s14 = inlined_call_operand.vmem [shape: f32[2,1,64], index: 14, kind: input, shape index: {}]   ;;  %s7354_s15 = inlined_call_operand.vmem [shape: f32[2,1,64], index: 15, kind: input, shape index: {}]   ;;  %s7355_s16 = inlined_call_operand.vmem [shape: f32[2,1,64], index: 16, kind: input, shape index: {}]   ;;  %s7356_s17 = inlined_call_operand.vmem [shape: bf16[2,64,256], index: 17, kind: input, shape index: {}]   ;;  %s7357_s18 = inlined_call_operand.vmem [shape: f32[2,1,256], index: 18, kind: input, shape index: {}]   ;;  %s7358_s19 = inlined_call_operand.vmem [shape: bf16[2,256,64], index: 19, kind: input, shape index: {}]   ;;  %s7359_s20 = inlined_call_operand.vmem [shape: f32[2,1,64], index: 20, kind: input, shape index: {}]   ;;  %s7360_s21 = inlined_call_operand.vmem [shape: f32[2,5,64], index: 21, kind: output, shape index: {}]  }
   0x1   :  { %7363 = sst [smem:[#allocation2_spill]] %s7339_s0 }
   0x2   :  { %7364 = sst [smem:[#allocation3_spill]] %s7340_s1 }
   0x3   :  { %7365 = sst [smem:[#allocation4_spill]] %s7341_s2  ;;  %s6282_s2 = smov 0  }
   0x4   :  { %7366 = sst [smem:[#allocation5_spill]] %s7342_s3 }
   0x5   :  { %7367 = sst [smem:[#allocation6_spill]] %s7343_s4 }
   0x6   :  { %7368 = sst [smem:[#allocation7_spill]] %s7344_s5 }
   0x7 LB: > { %s4843_s25 = sadd.s32 4294967295, %s6166_s2   ;;  %p4847_p0 = scmp.ge.s32.totalorder %s6166_s2, 1  ;;  %s6166_s2 = sphi %s6282_s2, %s31_s2  }
   0x8   : > { %p587_p1 = scmp.lt.s32.totalorder %s6166_s2, 3 }
   0xa   : > { %p588_p2 = pnand %p4847_p0, %p587_p1 }
   0xb   : > { %s7369_s3 = sld [smem:[#allocation3_spill]] (!%p588_p2)  ;;  %v6168_v1 = vmov (!%p588_p2), 0   ;;  %p646_p3 = scmp.lt.s32.totalorder (!%p588_p2), %s4843_s25, 1  ;;  %vm757_vm0 = vcmask (!%p588_p2), 523264   ;;  %vm803_vm1 = vcmask (!%p588_p2), 520192   ;;  %v5942_v43 = vld [vmem:[%s7346_s7] sm:$0xff] (!%p588_p2)  }
   0xc   : > { %591 = sbr.rel (%p588_p2) target bundleno = 4566 (0x11d6), region = 104  ;;  %761 = vmatprep.subr.bf16.mxu0 (!%p588_p2), %v6168_v1  ;;  %s7370_s23 = sld [smem:[#allocation2_spill]] (!%p588_p2)  ;;  %v5943_v44 = vld [vmem:[%s7346_s7 + $0x60] sm:$0xff] (!%p588_p2)   ;;  %v6169_v45 = vmov (!%p588_p2), 0.0   ;;  %v5944_v46 = vld [vmem:[%s7346_s7 + $0x8] sm:$0xff] (!%p588_p2)   ;;  %v5946_v48 = vld [vmem:[%s7346_s7 + $0x10] sm:$0xff] (!%p588_p2)  }
   0xd   : > { %s7371_s22 = sld [smem:[#allocation4_spill]] (!%p588_p2)  ;;  %s7372_s24 = sld [smem:[#allocation5_spill]] (!%p588_p2)  ;;  %5486 = vmatprep.subr.bf16.mxu1 (!%p588_p2), %v6169_v45  ;;  %v5945_v47 = vld [vmem:[%s7346_s7 + $0x68] sm:$0xff] (!%p588_p2)   ;;  %v5947_v49 = vld [vmem:[%s7346_s7 + $0x70] sm:$0xff] (!%p588_p2)   ;;  %v5948_v50 = vld [vmem:[%s7346_s7 + $0x18] sm:$0xff] (!%p588_p2)   ;;  %vm6170_vm2 = vmmov (!%p588_p2), 0  }
   0xe   : > { %s7373_s28 = sld [smem:[#allocation6_spill]] (!%p588_p2)  ;;  %5487 = vmatpush3.bf16.msra.mxu1 (!%p588_p2), %v5942_v43  ;;  %v5949_v51 = vld [vmem:[%s7346_s7 + $0x78] sm:$0xff] (!%p588_p2)   ;;  %5494 = vmatprep.mubr.msk.bf16.mxu1 (!%p588_p2), %vm6170_vm2, %v6169_v45  ;;  %v4867_v63 = vld [vmem:[%s7345_s6] ss:$0 sm:$0xff] (!%p588_p2)  ;;  %v5988_v43 = vld [vmem:[%s7348_s9 + $0x50] sm:$0xff] (!%p588_p2)   ;;  %vm1825_vm3 = vcmask (!%p588_p2), 130048  }
   0xf   : > { %5488 = vmatprep.subr.bf16.mxu1 (!%p588_p2), %v6169_v45  ;;  %vm2067_vm4 = vcmask (!%p588_p2), 1041408   ;;  %vm2068_vm5 = vcmask (!%p588_p2), 1042432   ;;  %vm2010_vm6 = vcmask (!%p588_p2), 36864   ;;  %vm2063_vm7 = vcmask (!%p588_p2), 39936  }
  0x11   : > { %v5930_v0 = vld [vmem:[%s7369_s3] sm:$0xff] (!%p588_p2)   ;;  %v5931_v2 = vld [vmem:[%s7369_s3 + $0x8] sm:$0xff] (!%p588_p2)   ;;  %v5932_v3 = vld [vmem:[%s7369_s3 + $0x10] sm:$0xff] (!%p588_p2)  }
  0x12   : > { %762 = vmatpush1.bf16.msra.mxu0 (!%p588_p2), %v5930_v0  ;;  %v5933_v4 = vld [vmem:[%s7369_s3 + $0x18] sm:$0xff] (!%p588_p2)   ;;  %v5934_v5 = vld [vmem:[%s7369_s3 + $0x20] sm:$0xff] (!%p588_p2)   ;;  %v5935_v8 = vld [vmem:[%s7369_s3 + $0x28] sm:$0xff] (!%p588_p2)   ;;  %5489 = vmatpush3.bf16.msra.mxu1 (!%p588_p2), %v5944_v46 }
  0x13   : > { %763 = vmatprep.subr.bf16.mxu0 %v6168_v1  ;;  %s7376_s25 = smov (!%p646_p3, %s4843_s25), 1  ;;  %v5936_v9 = vld [vmem:[%s7369_s3 + $0x30] sm:$0xff]   ;;  %v5937_v10 = vld [vmem:[%s7369_s3 + $0x38] sm:$0xff]   ;;  %v5938_v11 = vld [vmem:[%s7369_s3 + $0x40] sm:$0xff]   ;;  %5490 = vmatprep.subr.bf16.mxu1 %v6169_v45 }
  0x14   : > { %s5273_s30 = sshll.u32 %s7376_s25, 4  ;;  %v5939_v12 = vld [vmem:[%s7369_s3 + $0x48] sm:$0xff]   ;;  %v5940_v13 = vld [vmem:[%s7369_s3 + $0x50] sm:$0xff]   ;;  %v5941_v14 = vld [vmem:[%s7369_s3 + $0x58] sm:$0xff]  }
  0x15   : > { %s6308_s1 = scalar_lea.vmem %s7370_s23, %s5273_s30  ;;  %v684_v17 = vld [vmem:[%s7371_s22] sm:$0x1f]  ;;  %s4850_s30 = sshll.u32 %s7376_s25, 3 }
  0x16   : > { %764 = vmatpush1.bf16.msra.mxu0 %v5931_v2  ;;  %v657_v6 = vld [vmem:[%s6308_s1 + $0x8] sm:$0x1f]  ;;  %v656_v15 = vld [vmem:[%s6308_s1] sm:$0x1f]  ;;  %5491 = vmatpush3.bf16.msra.mxu1 %v5946_v48  ;;  %s7374_s1 = sld [smem:[#allocation7_spill]]  ;;  %s654_s26 = scalar_lea.vmem %s7360_s21, %s4850_s30 }
  0x17   : > { %765 = vmatprep.subr.bf16.mxu0 %v6168_v1  ;;  %v659_v7 = vpack.c.bf16 %v657_v6, %v657_v6  ;;  %v658_v16 = vpack.c.bf16 %v656_v15, %v656_v15  ;;  %v4864_v35 = vld [vmem:[%s7372_s24] ss:$0 sm:$0xff]  ;;  %5492 = vmatprep.subr.bf16.mxu1 %v6169_v45  ;;  %v5952_v6 = vld [vmem:[%s7346_s7 + $0x28] sm:$0xff]  }
  0x18   : > { %v4865_v37 = vld [vmem:[%s7373_s28] ss:$0 sm:$0xff]  ;;  %v5961_v15 = vld [vmem:[%s7347_s8 + $0x68] sm:$0xff]  }
  0x19   : > { %4863 = vmatprep.mubr.msk.bf16.mxu0 %vm757_vm0, %v659_v7  ;;  %v5953_v7 = vld [vmem:[%s7347_s8 + $0x28] sm:$0xff]  }
  0x1a   : > { %766 = vmatpush1.bf16.msra.mxu0 %v5932_v3  ;;  %5493 = vmatpush3.bf16.msra.mxu1 %v5948_v50  ;;  %v5950_v3 = vld [vmem:[%s7346_s7 + $0x20] sm:$0xff]  }
  0x1b   : > { %767 = vmatprep.subr.bf16.mxu0 %v6168_v1  ;;  %5498 = vmatprep.subr.bf16.mxu1 %v6169_v45 }
  0x1c   : > { %v4866_v61 = vld [vmem:[%s7374_s1] ss:$0 sm:$0xff] }
  0x1e   : > { %768 = vmatpush1.bf16.msra.mxu0 %v5933_v4  ;;  %v5951_v4 = vld [vmem:[%s7347_s8 + $0x20] sm:$0xff]  }
  0x1f   : > { %769 = vmatprep.subr.bf16.mxu0 %v6168_v1 }
  0x22   : > { %770 = vmatpush1.bf16.msra.mxu0 %v5934_v5 }
  0x23   : > { %771 = vmatprep.subr.bf16.mxu0 %v6168_v1 }
  0x26   : > { %772 = vmatpush1.bf16.msra.mxu0 %v5935_v8  ;;  %v5954_v8 = vld [vmem:[%s7346_s7 + $0x30] sm:$0xff]  }
  0x27   : > { %773 = vmatprep.subr.bf16.mxu0 %v6168_v1 }
  0x2a   : > { %774 = vmatpush1.bf16.msra.mxu0 %v5936_v9  ;;  %v5955_v9 = vld [vmem:[%s7347_s8 + $0x30] sm:$0xff]  }
  0x2b   : > { %775 = vmatprep.subr.bf16.mxu0 %v6168_v1 }
  0x2e   : > { %776 = vmatpush1.bf16.msra.mxu0 %v5937_v10  ;;  %v5956_v10 = vld [vmem:[%s7346_s7 + $0x38] sm:$0xff]  }
  0x2f   : > { %777 = vmatprep.subr.bf16.mxu0 %v6168_v1 }
  0x32   : > { %778 = vmatpush1.bf16.msra.mxu0 %v5938_v11  ;;  %v5957_v11 = vld [vmem:[%s7347_s8 + $0x38] sm:$0xff]  }
  0x33   : > { %779 = vmatprep.subr.bf16.mxu0 %v6168_v1 }
  0x36   : > { %780 = vmatpush1.bf16.msra.mxu0 %v5939_v12  ;;  %v5958_v12 = vld [vmem:[%s7346_s7 + $0x40] sm:$0xff]  }
  0x37   : > { %781 = vmatprep.subr.bf16.mxu0 %v6168_v1 }
  0x3a   : > { %782 = vmatpush1.bf16.msra.mxu0 %v5940_v13  ;;  %v5959_v13 = vld [vmem:[%s7347_s8 + $0x60] sm:$0xff]  }
  0x3b   : > { %783 = vmatprep.subr.bf16.mxu0 %v6168_v1 }
  0x3e   : > { %784 = vmatpush1.bf16.msra.mxu0 %v5941_v14  ;;  %v5960_v14 = vld [vmem:[%s7346_s7 + $0x48] sm:$0xff]  }
  0x3f   : > { %5522 = vmatprep.subr.bf16.mxu0 %v6169_v45 }
  0x41   : > { %794 = vmatmul.mubr.bf16.vlgmr.msra.gmra.mrb[0].mxu0 %v658_v16  ;;  %v5962_v16 = vld [vmem:[%s7346_s7 + $0x50] sm:$0xff]  }
  0x42   : > { %5523 = vmatpush3.bf16.msra.mxu0 %v5943_v44  ;;  %5530 = vmatprep.mubr.msk.bf16.mxu0 %vm6170_vm2, %v6169_v45  ;;  %v5989_v44 = vld [vmem:[%s7348_s9 + $0x58] sm:$0xff]  }
  0x43   : > { %5524 = vmatprep.subr.bf16.mxu0 %v6169_v45 }
  0x46   : > { %5525 = vmatpush3.bf16.msra.mxu0 %v5945_v47 }
  0x47   : > { %5526 = vmatprep.subr.bf16.mxu0 %v6169_v45 }
  0x4a   : > { %5527 = vmatpush3.bf16.msra.mxu0 %v5947_v49 }
  0x4b   : > { %5528 = vmatprep.subr.bf16.mxu0 %v6169_v45 }
  0x4e   : > { %5529 = vmatpush3.bf16.msra.mxu0 %v5949_v51 }
  0x4f   : > { %5546 = vmatprep.subr.bf16.mxu0 %v6169_v45 }
 0x114   : > { %v795_v18 = vpop.f32.mrb[0].mxu0 }
 0x115   : > { %v796_v19 = vadd.f32 %v795_v18, %v684_v17  ;;  %v797_v20 = vpop.f32.mrb[1].mxu0  ;;  %v5963_v17 = vld [vmem:[%s7347_s8 + $0x70] sm:$0xff]   ;;  %v5964_v18 = vld [vmem:[%s7346_s7 + $0x58] sm:$0xff]  }
 0x116   : > { %v798_v21 = vpop.f32.mrb[2].mxu0  ;;  %v5966_v20 = vld [vmem:[%s7347_s8] sm:$0xff]  }
 0x117   : > { %v799_v22 = vpop.f32.mrb[3].mxu0  ;;  %v804_v23 = vsel %vm803_vm1, %v796_v19, 0.0  ;;  %v809_v24 = vmul.f32 %v796_v19, %v796_v19  ;;  %v5967_v21 = vld [vmem:[%s7348_s9 + $0x20] sm:$0xff]  }
 0x118   : > { %805 = vadd.xlane.f32.xlu0 %v804_v23  ;;  %v5968_v22 = vld [vmem:[%s7347_s8 + $0x8] sm:$0xff]  }
 0x119   : > { %v810_v25 = vsel %vm803_vm1, %v809_v24, 0.0  ;;  %v5969_v23 = vld [vmem:[%s7348_s9 + $0x28] sm:$0xff]   ;;  %v5970_v24 = vld [vmem:[%s7347_s8 + $0x10] sm:$0xff]  }
 0x11c   : > { %811 = vadd.xlane.f32.xlu0 %v810_v25  ;;  %v5971_v25 = vld [vmem:[%s7348_s9 + $0x30] sm:$0xff]  }
 0x1a5   : > { %v806_v26 = vpop.xlane.xlu0 %805 }
 0x1a6   : > { %v808_v27 = vmul.f32 0.015625, %v806_v26  ;;  %v5972_v26 = vld [vmem:[%s7347_s8 + $0x18] sm:$0xff]  }
 0x1a8   : > { %v814_v29 = vmul.f32 %v808_v27, %v808_v27  ;;  %v816_v33 = vsub.f32 %v796_v19, %v808_v27  ;;  %v5965_v19 = vld [vmem:[%s7347_s8 + $0x78] sm:$0xff]  }
 0x1a9   : > { %v812_v28 = vpop.xlane.xlu0 %811  ;;  %v5973_v27 = vld [vmem:[%s7348_s9 + $0x38] sm:$0xff]  }
 0x1aa   : > { %v813_v30 = vmul.f32 0.015625, %v812_v28  ;;  %v5974_v28 = vld [vmem:[%s7347_s8 + $0x40] sm:$0xff]  }
 0x1ac   : > { %v815_v31 = vsub.f32 %v813_v30, %v814_v29  ;;  %v5975_v29 = vld [vmem:[%s7348_s9 + $0x60] sm:$0xff]   ;;  %v5976_v30 = vld [vmem:[%s7347_s8 + $0x48] sm:$0xff]  }
 0x1ae   : > { %v817_v32 = vadd.f32 1e-05, %v815_v31  ;;  %v5977_v31 = vld [vmem:[%s7348_s9 + $0x68] sm:$0xff]  }
 0x1b0   : > { %6102 = vrsqrt.f32 %v817_v32  ;;  %v5978_v32 = vld [vmem:[%s7347_s8 + $0x50] sm:$0xff]  }
 0x1ba   : > { %v6103_v34 = vpop.eup %6102 }
 0x1bb   : > { %v819_v36 = vmul.f32 %v6103_v34, %v816_v33  ;;  %v5979_v33 = vld [vmem:[%s7348_s9 + $0x70] sm:$0xff]   ;;  %v5980_v34 = vld [vmem:[%s7347_s8 + $0x58] sm:$0xff]  }
 0x1bd   : > { %v826_v38 = vmul.f32 %v4864_v35, %v819_v36  ;;  %v5981_v35 = vld [vmem:[%s7348_s9 + $0x78] sm:$0xff]   ;;  %v5982_v36 = vld [vmem:[%s7348_s9] sm:$0xff]  }
 0x1bf   : > { %v6360_v39 = vadd.f32 %v4865_v37, %v826_v38  ;;  %v5983_v37 = vld [vmem:[%s7348_s9 + $0x8] sm:$0xff]   ;;  %v5984_v38 = vld [vmem:[%s7348_s9 + $0x10] sm:$0xff]  }
 0x1c1   : > { %v836_v40 = vsel %vm803_vm1, %v6360_v39, 0.0  ;;  %v840_v41 = vmul.f32 %v6360_v39, %v6360_v39 }
 0x1c2   : > { %837 = vadd.xlane.f32.xlu1 %v836_v40  ;;  %v5985_v40 = vld [vmem:[%s7348_s9 + $0x18] sm:$0xff]  }
 0x1c3   : > { %v841_v42 = vsel %vm803_vm1, %v840_v41, 0.0  ;;  %v5986_v41 = vld [vmem:[%s7348_s9 + $0x40] sm:$0xff]  }
 0x1c6   : > { %842 = vadd.xlane.f32.xlu1 %v841_v42  ;;  %v5987_v42 = vld [vmem:[%s7348_s9 + $0x48] sm:$0xff]  }
 0x24f   : > { %v838_v52 = vpop.xlane.xlu1 %837 }
 0x250   : > { %v839_v53 = vmul.f32 0.015625, %v838_v52 }
 0x252   : > { %v845_v55 = vmul.f32 %v839_v53, %v839_v53  ;;  %v847_v59 = vsub.f32 %v6360_v39, %v839_v53 }
 0x253   : > { %v843_v54 = vpop.xlane.xlu1 %842 }
 0x254   : > { %v844_v56 = vmul.f32 0.015625, %v843_v54  ;;  %v4893_v54 = vld [vmem:[%s7350_s11 + $0x1] ss:$0 sm:$0xff] }
 0x256   : > { %v846_v57 = vsub.f32 %v844_v56, %v845_v55 }
 0x258   : > { %v848_v58 = vadd.f32 1e-05, %v846_v57 }
 0x25a   : > { %6104 = vrsqrt.f32 %v848_v58 }
 0x264   : > { %v6105_v60 = vpop.eup %6104 }
 0x265   : > { %v850_v62 = vmul.f32 %v6105_v60, %v847_v59 }
 0x267   : > { %v857_v0 = vmul.f32 %v4866_v61, %v850_v62 }
 0x269   : > { %v864_v2 = vadd.f32 %v4867_v63, %v857_v0 }
 0x26b   : > { %v6418_v5 = vpack.c.bf16 %v864_v2, %v864_v2  ;;  %v4869_v2 = vld [vmem:[%s7349_s10 + $0x1] ss:$0 sm:$0xff] }
 0x26d   : > { %5495 = vmatmul.mubr.msk.bf16.vlgmr.msra.gmra.mrb[0].mxu1 %vm757_vm0, %v6418_v5  ;;  %5531 = vmatmul.mubr.msk.bf16.vlgmr.msra.gmra.mrb[4].mxu0 %vm757_vm0, %v6418_v5 }
 0x26e   : > { %5499 = vmatpush3.bf16.msra.mxu1 %v5950_v3  ;;  %5547 = vmatpush3.bf16.msra.mxu0 %v5951_v4 }
 0x26f   : > { %5500 = vmatprep.subr.bf16.mxu1 %v6169_v45  ;;  %5548 = vmatprep.subr.bf16.mxu0 %v6169_v45 }
 0x270   : > { %5506 = vmatprep.mubr.msk.bf16.mxu1 %vm6170_vm2, %v6169_v45  ;;  %5554 = vmatprep.mubr.msk.bf16.mxu0 %vm6170_vm2, %v6169_v45 }
 0x272   : > { %5501 = vmatpush3.bf16.msra.mxu1 %v5952_v6  ;;  %5549 = vmatpush3.bf16.msra.mxu0 %v5953_v7  ;;  %v4895_v6 = vld [vmem:[%s7350_s11 + $0x3] ss:$0 sm:$0xff] }
 0x273   : > { %5502 = vmatprep.subr.bf16.mxu1 %v6169_v45  ;;  %5550 = vmatprep.subr.bf16.mxu0 %v6169_v45 }
 0x276   : > { %5503 = vmatpush3.bf16.msra.mxu1 %v5954_v8  ;;  %5551 = vmatpush3.bf16.msra.mxu0 %v5955_v9 }
 0x277   : > { %5504 = vmatprep.subr.bf16.mxu1 %v6169_v45  ;;  %5552 = vmatprep.subr.bf16.mxu0 %v6169_v45 }
 0x27a   : > { %5505 = vmatpush3.bf16.msra.mxu1 %v5956_v10  ;;  %5553 = vmatpush3.bf16.msra.mxu0 %v5957_v11 }
 0x27b   : > { %5510 = vmatprep.subr.bf16.mxu1 %v6169_v45  ;;  %5570 = vmatprep.subr.bf16.mxu0 %v6169_v45 }
 0x27d   : > { %5507 = vmatmul.mubr.msk.bf16.vlgmr.msra.gmra.mrb[4].mxu1 %vm757_vm0, %v6418_v5  ;;  %5555 = vmatmul.mubr.msk.bf16.vlgmr.msra.gmra.mrb[8].mxu0 %vm757_vm0, %v6418_v5 }
 0x27e   : > { %5511 = vmatpush3.bf16.msra.mxu1 %v5958_v12  ;;  %5571 = vmatpush3.bf16.msra.mxu0 %v5959_v13 }
 0x27f   : > { %5512 = vmatprep.subr.bf16.mxu1 %v6169_v45  ;;  %5572 = vmatprep.subr.bf16.mxu0 %v6169_v45 }
 0x280   : > { %5518 = vmatprep.mubr.msk.bf16.mxu1 %vm6170_vm2, %v6169_v45  ;;  %5578 = vmatprep.mubr.msk.bf16.mxu0 %vm6170_vm2, %v6169_v45 }
 0x282   : > { %5513 = vmatpush3.bf16.msra.mxu1 %v5960_v14  ;;  %5573 = vmatpush3.bf16.msra.mxu0 %v5961_v15 }
 0x283   : > { %5514 = vmatprep.subr.bf16.mxu1 %v6169_v45  ;;  %5574 = vmatprep.subr.bf16.mxu0 %v6169_v45 }
 0x286   : > { %5515 = vmatpush3.bf16.msra.mxu1 %v5962_v16  ;;  %5575 = vmatpush3.bf16.msra.mxu0 %v5963_v17  ;;  %v4871_v17 = vld [vmem:[%s7349_s10 + $0x3] ss:$0 sm:$0xff] }
 0x287   : > { %5516 = vmatprep.subr.bf16.mxu1 %v6169_v45  ;;  %5576 = vmatprep.subr.bf16.mxu0 %v6169_v45 }
 0x28a   : > { %5517 = vmatpush3.bf16.msra.mxu1 %v5964_v18  ;;  %5577 = vmatpush3.bf16.msra.mxu0 %v5965_v19 }
 0x28b   : > { %5534 = vmatprep.subr.bf16.mxu1 %v6169_v45  ;;  %5594 = vmatprep.subr.bf16.mxu0 %v6169_v45 }
 0x28d   : > { %5519 = vmatmul.mubr.msk.bf16.vlgmr.msra.gmra.mrb[8].mxu1 %vm757_vm0, %v6418_v5  ;;  %5579 = vmatmul.mubr.msk.bf16.vlgmr.msra.gmra.mrb[12].mxu0 %vm757_vm0, %v6418_v5 }
 0x28e   : > { %5535 = vmatpush3.bf16.msra.mxu1 %v5966_v20  ;;  %5595 = vmatpush3.bf16.msra.mxu0 %v5967_v21  ;;  %v4892_v21 = vld [vmem:[%s7350_s11] ss:$0 sm:$0xff] }
 0x28f   : > { %5536 = vmatprep.subr.bf16.mxu1 %v6169_v45  ;;  %5596 = vmatprep.subr.bf16.mxu0 %v6169_v45 }
 0x290   : > { %5542 = vmatprep.mubr.msk.bf16.mxu1 %vm6170_vm2, %v6169_v45  ;;  %5602 = vmatprep.mubr.msk.bf16.mxu0 %vm6170_vm2, %v6169_v45 }
 0x292   : > { %5537 = vmatpush3.bf16.msra.mxu1 %v5968_v22  ;;  %5597 = vmatpush3.bf16.msra.mxu0 %v5969_v23  ;;  %v4917_v22 = vld [vmem:[%s7351_s12 + $0x1] ss:$0 sm:$0xff]  ;;  %v6171_v23 = vmov 65535  }
 0x293   : > { %5538 = vmatprep.subr.bf16.mxu1 %v6169_v45  ;;  %5598 = vmatprep.subr.bf16.mxu0 %v6169_v45 }
 0x296   : > { %5539 = vmatpush3.bf16.msra.mxu1 %v5970_v24  ;;  %5599 = vmatpush3.bf16.msra.mxu0 %v5971_v25  ;;  %v2069_v24 = vsel %vm2067_vm4, 4294967295, %v6171_v23 }
 0x297   : > { %5540 = vmatprep.subr.bf16.mxu1 %v6169_v45  ;;  %5600 = vmatprep.subr.bf16.mxu0 %v6169_v45 }
 0x29a   : > { %5541 = vmatpush3.bf16.msra.mxu1 %v5972_v26  ;;  %5601 = vmatpush3.bf16.msra.mxu0 %v5973_v27 }
 0x29b   : > { %5558 = vmatprep.subr.bf16.mxu1 %v6169_v45  ;;  %5618 = vmatprep.subr.bf16.mxu0 %v6169_v45 }
 0x29d   : > { %5543 = vmatmul.mubr.msk.bf16.vlgmr.msra.gmra.mrb[12].mxu1 %vm757_vm0, %v6418_v5  ;;  %5603 = vmatmul.mubr.msk.bf16.vlgmr.msra.gmra.mrb[16].mxu0 %vm757_vm0, %v6418_v5 }
 0x29e   : > { %5559 = vmatpush3.bf16.msra.mxu1 %v5974_v28  ;;  %5619 = vmatpush3.bf16.msra.mxu0 %v5975_v29 }
 0x29f   : > { %5560 = vmatprep.subr.bf16.mxu1 %v6169_v45  ;;  %5620 = vmatprep.subr.bf16.mxu0 %v6169_v45 }
 0x2a0   : > { %5566 = vmatprep.mubr.msk.bf16.mxu1 %vm6170_vm2, %v6169_v45  ;;  %5626 = vmatprep.mubr.msk.bf16.mxu0 %vm6170_vm2, %v6169_v45 }
 0x2a2   : > { %5561 = vmatpush3.bf16.msra.mxu1 %v5976_v30  ;;  %5621 = vmatpush3.bf16.msra.mxu0 %v5977_v31  ;;  %v6652_v31 = vsel %vm2068_vm5, %v2069_v24, 0 }
 0x2a3   : > { %5562 = vmatprep.subr.bf16.mxu1 %v6169_v45  ;;  %5622 = vmatprep.subr.bf16.mxu0 %v6169_v45 }
 0x2a6   : > { %5563 = vmatpush3.bf16.msra.mxu1 %v5978_v32  ;;  %5623 = vmatpush3.bf16.msra.mxu0 %v5979_v33 }
 0x2a7   : > { %5564 = vmatprep.subr.bf16.mxu1 %v6169_v45  ;;  %5624 = vmatprep.subr.bf16.mxu0 %v6169_v45 }
 0x2aa   : > { %5565 = vmatpush3.bf16.msra.mxu1 %v5980_v34  ;;  %5625 = vmatpush3.bf16.msra.mxu0 %v5981_v35 }
 0x2ab   : > { %5582 = vmatprep.subr.bf16.mxu1 %v6169_v45  ;;  %5630 = vmatprep.subr.bf16.mxu0 %v6169_v45 }
 0x2ad   : > { %5567 = vmatmul.mubr.msk.bf16.vlgmr.msra.gmra.mrb[16].mxu1 %vm757_vm0, %v6418_v5  ;;  %5627 = vmatmul.mubr.msk.bf16.vlgmr.msra.gmra.mrb[20].mxu0 %vm757_vm0, %v6418_v5 }
 0x2ae   : > { %5583 = vmatpush3.bf16.msra.mxu1 %v5982_v36  ;;  %5590 = vmatprep.mubr.msk.bf16.mxu1 %vm6170_vm2, %v6169_v45 }
 0x2af   : > { %5584 = vmatprep.subr.bf16.mxu1 %v6169_v45  ;;  %5632 = vmatprep.mubr.msk.bf16.mxu0 %vm6170_vm2, %v6169_v45 }
 0x2b2   : > { %5585 = vmatpush3.bf16.msra.mxu1 %v5983_v37 }
 0x2b3   : > { %5586 = vmatprep.subr.bf16.mxu1 %v6169_v45 }
 0x2b6   : > { %5587 = vmatpush3.bf16.msra.mxu1 %v5984_v38  ;;  %v4868_v38 = vld [vmem:[%s7349_s10] ss:$0 sm:$0xff] }
 0x2b7   : > { %5588 = vmatprep.subr.bf16.mxu1 %v6169_v45 }
 0x2ba   : > { %5589 = vmatpush3.bf16.msra.mxu1 %v5985_v40 }
 0x2bb   : > { %5606 = vmatprep.subr.bf16.mxu1 %v6169_v45 }
 0x2bd   : > { %5591 = vmatmul.mubr.msk.bf16.vlgmr.msra.gmra.mrb[20].mxu1 %vm757_vm0, %v6418_v5 }
 0x2be   : > { %5607 = vmatpush3.bf16.msra.mxu1 %v5986_v41  ;;  %5614 = vmatprep.mubr.msk.bf16.mxu1 %vm6170_vm2, %v6169_v45 }
 0x2bf   : > { %5608 = vmatprep.subr.bf16.mxu1 %v6169_v45 }
 0x2c2   : > { %5609 = vmatpush3.bf16.msra.mxu1 %v5987_v42 }
 0x2c3   : > { %5610 = vmatprep.subr.bf16.mxu1 %v6169_v45 }
 0x2c6   : > { %5611 = vmatpush3.bf16.msra.mxu1 %v5988_v43 }
 0x2c7   : > { %5612 = vmatprep.subr.bf16.mxu1 %v6169_v45 }
 0x2ca   : > { %5613 = vmatpush3.bf16.msra.mxu1 %v5989_v44  ;;  %v4894_v44 = vld [vmem:[%s7350_s11 + $0x2] ss:$0 sm:$0xff] }
 0x2cb   : > { %5636 = vmatprep.subr.bf16.mxu1 %v6169_v45 }
 0x2cd   : > { %5615 = vmatmul.mubr.msk.bf16.vlgmr.msra.gmra.mrb[24].mxu1 %vm757_vm0, %v6418_v5 }
 0x2ce   : > { %5638 = vmatprep.mubr.msk.bf16.mxu1 %vm6170_vm2, %v6169_v45 }
 0x340   : > { %v6622_v46 = vpop.f32.mrb[0].mxu1  ;;  %v1179_v47 = vpop.f32.mrb[4].mxu0 }
 0x341   : > { %v5496_v48 = vpop.f32.mrb[1].mxu1  ;;  %v5532_v49 = vpop.f32.mrb[5].mxu0  ;;  %v1180_v19 = vadd.f32 %v4871_v17, %v1179_v47  ;;  %v988_v42 = vadd.f32 %v4868_v38, %v6622_v46 }
 0x342   : > { %v990_v50 = vpop.f32.mrb[2].mxu1  ;;  %v1182_v51 = vpop.f32.mrb[6].mxu0 }
 0x343   : > { %v5497_v52 = vpop.f32.mrb[3].mxu1  ;;  %v5533_v53 = vpop.f32.mrb[7].mxu0  ;;  %v1820_v20 = vpack.c.bf16 %v1180_v19, %v1180_v19  ;;  %v1817_v43 = vpack.c.bf16 %v988_v42, %v988_v42 }
 0x350   : > { %v1051_v55 = vpop.f32.mrb[4].mxu1  ;;  %v1367_v56 = vpop.f32.mrb[8].mxu0 }
 0x351   : > { %v1368_v57 = vadd.f32 %v4893_v54, %v1367_v56  ;;  %v5508_v58 = vpop.f32.mrb[5].mxu1  ;;  %v5556_v59 = vpop.f32.mrb[9].mxu0  ;;  %v1052_v4 = vadd.f32 %v4869_v2, %v1051_v55  ;;  %v4870_v56 = vld [vmem:[%s7349_s10 + $0x2] ss:$0 sm:$0xff] }
 0x352   : > { %v1054_v60 = vpop.f32.mrb[6].mxu1  ;;  %v1370_v61 = vpop.f32.mrb[10].mxu0 }
 0x353   : > { %v1822_v62 = vpack.c.bf16 %v1368_v57, %v1368_v57  ;;  %v5509_v63 = vpop.f32.mrb[7].mxu1  ;;  %v5557_v0 = vpop.f32.mrb[11].mxu0  ;;  %v1818_v5 = vpack.c.bf16 %v1052_v4, %v1052_v4  ;;  %v4916_v60 = vld [vmem:[%s7351_s12] ss:$0 sm:$0xff] }
 0x355   : > { %v1876_v3 = vsel %vm1825_vm3, %v1822_v62, 0 }
 0x356   : > { %5637 = vmatpush3.bf16.xpose.msra.mxu1 %v1876_v3 }
 0x357   : > { %5648 = vmatprep.subr.bf16.mxu1 %v6169_v45 }
 0x35d   : > { %5639 = vmatmul.mubr.msk.bf16.vlgmr.msra.gmra.mrb[28].mxu1 %vm1825_vm3, %v1818_v5 }
 0x35e   : > { %5650 = vmatprep.mubr.msk.bf16.mxu1 %vm6170_vm2, %v6169_v45 }
 0x360   : > { %v1115_v7 = vpop.f32.mrb[8].mxu1  ;;  %v1495_v8 = vpop.f32.mrb[12].mxu0 }
 0x361   : > { %v1496_v9 = vadd.f32 %v4895_v6, %v1495_v8  ;;  %v5520_v10 = vpop.f32.mrb[9].mxu1  ;;  %v5580_v11 = vpop.f32.mrb[13].mxu0  ;;  %v1116_v58 = vadd.f32 %v4870_v56, %v1115_v7 }
 0x362   : > { %v1118_v12 = vpop.f32.mrb[10].mxu1  ;;  %v1498_v13 = vpop.f32.mrb[14].mxu0 }
 0x363   : > { %v1824_v14 = vpack.c.bf16 %v1496_v9, %v1496_v9  ;;  %v5521_v15 = vpop.f32.mrb[11].mxu1  ;;  %v5581_v16 = vpop.f32.mrb[15].mxu0  ;;  %v1819_v59 = vpack.c.bf16 %v1116_v58, %v1116_v58 }
 0x365   : > { %v1968_v18 = vsel %vm1825_vm3, %v1824_v14, 0 }
 0x366   : > { %5649 = vmatpush3.bf16.xpose.msra.mxu1 %v1968_v18 }
 0x367   : > { %5660 = vmatprep.subr.bf16.mxu1 %v6169_v45 }
 0x36d   : > { %5651 = vmatmul.mubr.msk.bf16.vlgmr.msra.gmra.mrb[32].mxu1 %vm1825_vm3, %v1820_v20 }
 0x36e   : > { %5662 = vmatprep.mubr.msk.bf16.mxu1 %vm6170_vm2, %v6169_v45 }
 0x370   : > { %v1303_v25 = vpop.f32.mrb[12].mxu1  ;;  %v1683_v26 = vpop.f32.mrb[16].mxu0 }
 0x371   : > { %v1304_v27 = vadd.f32 %v4892_v21, %v1303_v25  ;;  %v1684_v28 = vadd.f32 %v4917_v22, %v1683_v26  ;;  %v5544_v29 = vpop.f32.mrb[13].mxu1  ;;  %v5604_v30 = vpop.f32.mrb[17].mxu0 }
 0x372   : > { %v1306_v32 = vpop.f32.mrb[14].mxu1  ;;  %v1686_v33 = vpop.f32.mrb[18].mxu0 }
 0x373   : > { %v1821_v34 = vpack.c.bf16 %v1304_v27, %v1304_v27  ;;  %v2060_v35 = vpack.c.bf16 %v1684_v28, %v1684_v28  ;;  %v5545_v36 = vpop.f32.mrb[15].mxu1  ;;  %v5605_v37 = vpop.f32.mrb[19].mxu0 }
 0x375   : > { %v1830_v40 = vsel %vm1825_vm3, %v1821_v34, 0  ;;  %v2118_v41 = vand.u32 %v6652_v31, %v2060_v35 }
 0x376   : > { %5631 = vmatpush3.bf16.xpose.msra.mxu0 %v1830_v40 }
 0x377   : > { %5661 = vmatpush3.bf16.msra.mxu1 %v2118_v41  ;;  %5642 = vmatprep.subr.bf16.mxu0 %v6169_v45 }
 0x378   : > { %5672 = vmatprep.subr.bf16.mxu1 %v6169_v45 }
 0x37d   : > { %5633 = vmatmul.mubr.msk.bf16.vlgmr.msra.gmra.mrb[24].mxu0 %vm1825_vm3, %v1817_v43 }
 0x37e   : > { %5644 = vmatprep.mubr.msk.bf16.mxu0 %vm6170_vm2, %v6169_v45 }
 0x380   : > { %v1431_v47 = vpop.f32.mrb[16].mxu1  ;;  %v6668_v48 = vpop.f32.mrb[20].mxu0 }
 0x381   : > { %v1432_v49 = vadd.f32 %v4894_v44, %v1431_v47  ;;  %v5568_v46 = vpop.f32.mrb[17].mxu1  ;;  %v5628_v50 = vpop.f32.mrb[21].mxu0 }
 0x382   : > { %v1434_v51 = vpop.f32.mrb[18].mxu1  ;;  %v1814_v52 = vpop.f32.mrb[22].mxu0 }
 0x383   : > { %v1823_v53 = vpack.c.bf16 %v1432_v49, %v1432_v49  ;;  %v5569_v54 = vpop.f32.mrb[19].mxu1  ;;  %v5629_v55 = vpop.f32.mrb[23].mxu0 }
 0x384   : > { %v4919_v54 = vld [vmem:[%s7351_s12 + $0x3] ss:$0 sm:$0xff] }
 0x385   : > { %v1922_v57 = vsel %vm1825_vm3, %v1823_v53, 0  ;;  %v1812_v55 = vadd.f32 %v4919_v54, %v6668_v48 }
 0x386   : > { %5643 = vmatpush3.bf16.xpose.msra.mxu0 %v1922_v57 }
 0x387   : > { %5654 = vmatprep.subr.bf16.mxu0 %v6169_v45  ;;  %v2062_v57 = vpack.c.bf16 %v1812_v55, %v1812_v55 }
 0x38d   : > { %5645 = vmatmul.mubr.msk.bf16.vlgmr.msra.gmra.mrb[28].mxu0 %vm1825_vm3, %v1819_v59 }
 0x38e   : > { %5656 = vmatprep.mubr.msk.bf16.mxu0 %vm6170_vm2, %v6169_v45 }
 0x390   : > { %v1619_v61 = vpop.f32.mrb[20].mxu1 }
 0x391   : > { %v1620_v62 = vadd.f32 %v4916_v60, %v1619_v61  ;;  %v5592_v63 = vpop.f32.mrb[21].mxu1  ;;  %v2210_v60 = vand.u32 %v6652_v31, %v2062_v57 }
 0x392   : > { %v1622_v0 = vpop.f32.mrb[22].mxu1 }
 0x393   : > { %v2059_v2 = vpack.c.bf16 %v1620_v62, %v1620_v62  ;;  %v5593_v3 = vpop.f32.mrb[23].mxu1 }
 0x395   : > { %v2072_v4 = vand.u32 %v6652_v31, %v2059_v2  ;;  %v4918_v2 = vld [vmem:[%s7351_s12 + $0x2] ss:$0 sm:$0xff] }
 0x397   : > { %5655 = vmatpush3.bf16.msra.mxu0 %v2072_v4 }
 0x398   : > { %5666 = vmatprep.subr.bf16.mxu0 %v6169_v45 }
 0x3a0   : > { %v6683_v5 = vpop.f32.mrb[24].mxu1 }
 0x3a1   : > { %v5616_v6 = vpop.f32.mrb[25].mxu1  ;;  %v1748_v3 = vadd.f32 %v4918_v2, %v6683_v5  ;;  %v5990_v5 = vld [vmem:[%s7352_s13 + $0x8] sm:$0xff]  }
 0x3a2   : > { %v1750_v7 = vpop.f32.mrb[26].mxu1 }
 0x3a3   : > { %v5617_v8 = vpop.f32.mrb[27].mxu1  ;;  %v2061_v6 = vpack.c.bf16 %v1748_v3, %v1748_v3 }
 0x430   : > { %v1912_v9 = vpop.f32.mrb[28].mxu1 }
 0x431   : > { %v5640_v10 = vpop.f32.mrb[29].mxu1  ;;  %v2014_v11 = vsel %vm2010_vm6, %v1912_v9, -inf }
 0x432   : > { %2015 = vmax.xlane.f32.xlu1 %v2014_v11  ;;  %v1915_v12 = vpop.f32.mrb[30].mxu1 }
 0x433   : > { %v5641_v13 = vpop.f32.mrb[31].mxu1 }
 0x440   : > { %v2004_v14 = vpop.f32.mrb[32].mxu1 }
 0x441   : > { %v5652_v15 = vpop.f32.mrb[33].mxu1  ;;  %v2020_v16 = vsel %vm2010_vm6, %v2004_v14, -inf }
 0x442   : > { %2021 = vmax.xlane.f32.xlu1 %v2020_v16  ;;  %v2007_v17 = vpop.f32.mrb[34].mxu1  ;;  %v5991_v16 = vld [vmem:[%s7352_s13 + $0x18] sm:$0xff]  }
 0x443   : > { %v5653_v18 = vpop.f32.mrb[35].mxu1 }
 0x450   : > { %v1866_v19 = vpop.f32.mrb[24].mxu0 }
 0x451   : > { %v5634_v20 = vpop.f32.mrb[25].mxu0  ;;  %v2011_v21 = vsel %vm2010_vm6, %v1866_v19, -inf }
 0x452   : > { %2012 = vmax.xlane.f32.xlu0 %v2011_v21  ;;  %v1869_v22 = vpop.f32.mrb[26].mxu0 }
 0x453   : > { %v5635_v23 = vpop.f32.mrb[27].mxu0 }
 0x460   : > { %v1958_v24 = vpop.f32.mrb[28].mxu0 }
 0x461   : > { %v5646_v25 = vpop.f32.mrb[29].mxu0  ;;  %v2017_v26 = vsel %vm2010_vm6, %v1958_v24, -inf }
 0x462   : > { %2018 = vmax.xlane.f32.xlu0 %v2017_v26  ;;  %v1961_v27 = vpop.f32.mrb[30].mxu0 }
 0x463   : > { %v5647_v28 = vpop.f32.mrb[31].mxu0  ;;  %v5993_v27 = vld [vmem:[%s7352_s13 + $0x10] sm:$0xff]  }
 0x4bf   : > { %v2016_v29 = vpop.xlane.xlu1 %2015 }
 0x4c0   : > { %v2024_v30 = vsub.f32 %v1912_v9, %v2016_v29  ;;  %v2164_v9 = vand.u32 %v6652_v31, %v2061_v6 }
 0x4c2   : > { %v2029_v32 = vmul.f32 1.442695, %v2024_v30 }
 0x4c4   : > { %6106 = vpow2.f32 %v2029_v32 }
 0x4ce   : > { %v6107_v33 = vpop.eup %6106 }
 0x4cf   : > { %v2022_v34 = vpop.xlane.xlu1 %2021  ;;  %v2038_v35 = vsel %vm2010_vm6, %v6107_v33, 0.0 }
 0x4d0   : > { %v2026_v36 = vsub.f32 %v2004_v14, %v2022_v34  ;;  %2039 = vadd.xlane.f32.xlu1 %v2038_v35  ;;  %v5992_v14 = vld [vmem:[%s7352_s13] sm:$0xff]  }
 0x4d2   : > { %v2033_v37 = vmul.f32 1.442695, %v2026_v36 }
 0x4d4   : > { %6108 = vpow2.f32 %v2033_v37 }
 0x4de   : > { %v6109_v38 = vpop.eup %6108 }
 0x4df   : > { %v2013_v40 = vpop.xlane.xlu0 %2012  ;;  %v2044_v41 = vsel %vm2010_vm6, %v6109_v38, 0.0 }
 0x4e0   : > { %v2023_v42 = vsub.f32 %v1866_v19, %v2013_v40  ;;  %2045 = vadd.xlane.f32.xlu1 %v2044_v41 }
 0x4e2   : > { %v2027_v43 = vmul.f32 1.442695, %v2023_v42 }
 0x4e4   : > { %6110 = vpow2.f32 %v2027_v43 }
 0x4ee   : > { %v6111_v44 = vpop.eup %6110 }
 0x4ef   : > { %v2019_v47 = vpop.xlane.xlu0 %2018  ;;  %v2035_v49 = vsel %vm2010_vm6, %v6111_v44, 0.0 }
 0x4f0   : > { %v2025_v46 = vsub.f32 %v1958_v24, %v2019_v47  ;;  %2036 = vadd.xlane.f32.xlu0 %v2035_v49 }
 0x4f2   : > { %v2031_v50 = vmul.f32 1.442695, %v2025_v46 }
 0x4f4   : > { %6112 = vpow2.f32 %v2031_v50 }
 0x4fe   : > { %v6113_v51 = vpop.eup %6112 }
 0x4ff   : > { %v2041_v52 = vsel %vm2010_vm6, %v6113_v51, 0.0 }
 0x500   : > { %2042 = vadd.xlane.f32.xlu0 %v2041_v52 }
 0x55d   : > { %v2040_v53 = vpop.xlane.xlu1 %2039 }
 0x55e   : > { %6114 = vrcp.f32 %v2040_v53 }
 0x568   : > { %v6115_v56 = vpop.eup %6114 }
 0x569   : > { %v2052_v58 = vmul.f32 %v6115_v56, %v6107_v33 }
 0x56b   : > { %v2056_v59 = vpack.c.bf16 %v2052_v58, %v2052_v58 }
 0x56d   : > { %5663 = vmatmul.mubr.msk.bf16.vlgmr.msra.gmra.mrb[36].mxu1 %vm2063_vm7, %v2056_v59  ;;  %v2046_v61 = vpop.xlane.xlu1 %2045 }
 0x56e   : > { %5673 = vmatpush3.bf16.msra.mxu1 %v2210_v60  ;;  %6116 = vrcp.f32 %v2046_v61  ;;  %5674 = vmatprep.mubr.msk.bf16.mxu1 %vm6170_vm2, %v6169_v45 }
 0x56f   : > { %5684 = vmatprep.subr.bf16.mxu1 %v6169_v45 }
 0x578   : > { %v6117_v62 = vpop.eup %6116 }
 0x579   : > { %v2054_v63 = vmul.f32 %v6117_v62, %v6109_v38 }
 0x57b   : > { %v2058_v48 = vpack.c.bf16 %v2054_v63, %v2054_v63 }
 0x57d   : > { %v2037_v0 = vpop.xlane.xlu0 %2036  ;;  %5675 = vmatmul.mubr.msk.bf16.vlgmr.msra.gmra.mrb[40].mxu1 %vm2063_vm7, %v2058_v48  ;;  %v4956_v48 = vld [vmem:[%s7353_s14] ss:$0 sm:$0xff] }
 0x57e   : > { %6118 = vrcp.f32 %v2037_v0  ;;  %5686 = vmatprep.mubr.msk.bf16.mxu1 %vm6170_vm2, %v6169_v45  ;;  %5685 = vmatpush3.bf16.msra.mxu1 %v5990_v5 }
 0x57f   : > { %5696 = vmatprep.subr.bf16.mxu1 %v6169_v45 }
 0x588   : > { %v6119_v4 = vpop.eup %6118 }
 0x589   : > { %v2051_v7 = vmul.f32 %v6119_v4, %v6111_v44 }
 0x58b   : > { %v2055_v8 = vpack.c.bf16 %v2051_v7, %v2051_v7  ;;  %v5996_v7 = vld [vmem:[%s7356_s17 + $0x4] ss:$8 sps:$4 sm:$0xff]  }
 0x58d   : > { %v2043_v10 = vpop.xlane.xlu0 %2042  ;;  %5657 = vmatmul.mubr.msk.bf16.vlgmr.msra.gmra.mrb[32].mxu0 %vm2063_vm7, %v2055_v8  ;;  %v5999_v8 = vld [vmem:[%s7356_s17 + $0x14] ss:$8 sps:$4 sm:$0xff]  }
 0x58e   : > { %6120 = vrcp.f32 %v2043_v10  ;;  %5667 = vmatpush3.bf16.msra.mxu0 %v2164_v9  ;;  %5668 = vmatprep.mubr.msk.bf16.mxu0 %vm6170_vm2, %v6169_v45  ;;  %v5997_v9 = vld [vmem:[%s7356_s17 + $0x10] ss:$8 sps:$4 sm:$0xff]   ;;  %v6002_v10 = vld [vmem:[%s7356_s17 + $0x24] ss:$8 sps:$4 sm:$0xff]  }
 0x58f   : > { %5678 = vmatprep.subr.bf16.mxu0 %v6169_v45 }
 0x598   : > { %v6121_v11 = vpop.eup %6120 }
 0x599   : > { %v2053_v12 = vmul.f32 %v6121_v11, %v6113_v51  ;;  %v6000_v11 = vld [vmem:[%s7356_s17 + $0x20] ss:$8 sps:$4 sm:$0xff]  }
 0x59b   : > { %v2057_v13 = vpack.c.bf16 %v2053_v12, %v2053_v12  ;;  %v6005_v12 = vld [vmem:[%s7356_s17 + $0x34] ss:$8 sps:$4 sm:$0xff]  }
 0x59d   : > { %5669 = vmatmul.mubr.msk.bf16.vlgmr.msra.gmra.mrb[36].mxu0 %vm2063_vm7, %v2057_v13  ;;  %v6003_v13 = vld [vmem:[%s7356_s17 + $0x30] ss:$8 sps:$4 sm:$0xff]  }
 0x59e   : > { %5680 = vmatprep.mubr.msk.bf16.mxu0 %vm6170_vm2, %v6169_v45  ;;  %5679 = vmatpush3.bf16.msra.mxu0 %v5992_v14 }
 0x59f   : > { %5690 = vmatprep.subr.bf16.mxu0 %v6169_v45 }
 0x640   : > { %v2154_v15 = vpop.f32.mrb[36].mxu1 }
 0x641   : > { %v2261_v17 = vpack.c.bf16 %v2154_v15, %v2154_v15  ;;  %v5664_v18 = vpop.f32.mrb[37].mxu1 }
 0x642   : > { %v2157_v19 = vpop.f32.mrb[38].mxu1 }
 0x643   : > { %v5665_v20 = vpop.f32.mrb[39].mxu1  ;;  %5687 = vmatmul.mubr.msk.bf16.vlgmr.msra.gmra.mrb[44].mxu1 %vm1825_vm3, %v2261_v17 }
 0x644   : > { %5697 = vmatpush3.bf16.msra.mxu1 %v5991_v16  ;;  %5698 = vmatprep.mubr.msk.bf16.mxu1 %vm6170_vm2, %v6169_v45 }
 0x650   : > { %v2246_v21 = vpop.f32.mrb[40].mxu1 }
 0x651   : > { %v2263_v22 = vpack.c.bf16 %v2246_v21, %v2246_v21  ;;  %v5676_v23 = vpop.f32.mrb[41].mxu1 }
 0x652   : > { %v2249_v24 = vpop.f32.mrb[42].mxu1 }
 0x653   : > { %v5677_v25 = vpop.f32.mrb[43].mxu1  ;;  %5699 = vmatmul.mubr.msk.bf16.vlgmr.msra.gmra.mrb[48].mxu1 %vm1825_vm3, %v2263_v22  ;;  %v4957_v22 = vld [vmem:[%s7354_s15] ss:$0 sm:$0xff] }
 0x654   : > { %v4958_v24 = vld [vmem:[%s7355_s16] ss:$0 sm:$0xff] }
 0x660   : > { %v2108_v26 = vpop.f32.mrb[32].mxu0 }
 0x661   : > { %v2260_v28 = vpack.c.bf16 %v2108_v26, %v2108_v26  ;;  %v5658_v29 = vpop.f32.mrb[33].mxu0 }
 0x662   : > { %v2111_v30 = vpop.f32.mrb[34].mxu0  ;;  %v6007_v29 = vld [vmem:[%s7358_s19] sm:$0xff]  }
 0x663   : > { %v5659_v32 = vpop.f32.mrb[35].mxu0  ;;  %5681 = vmatmul.mubr.msk.bf16.vlgmr.msra.gmra.mrb[40].mxu0 %vm1825_vm3, %v2260_v28  ;;  %v6006_v28 = vld [vmem:[%s7358_s19 + $0x40] sm:$0xff]   ;;  %v6008_v30 = vld [vmem:[%s7358_s19 + $0x48] sm:$0xff]  }
 0x664   : > { %5691 = vmatpush3.bf16.msra.mxu0 %v5993_v27  ;;  %5692 = vmatprep.mubr.msk.bf16.mxu0 %vm6170_vm2, %v6169_v45  ;;  %v6009_v32 = vld [vmem:[%s7358_s19 + $0x8] sm:$0xff]  }
 0x665   : > { %2571 = vmatprep.subr.bf16.mxu0 %v5996_v7  ;;  %5358 = vmatprep.subr.bf16.mxu1 %v6006_v28  ;;  %v6029_v28 = vld [vmem:[%s7346_s7 + $0xd8] sm:$0xff]  }
 0x666   : > { %5359 = vmatpush3.bf16.msra.mxu1 %v6007_v29 }
 0x667   : > { %5360 = vmatprep.subr.bf16.mxu1 %v6008_v30 }
 0x66a   : > { %5361 = vmatpush3.bf16.msra.mxu1 %v6009_v32 }
 0x670   : > { %v2200_v33 = vpop.f32.mrb[36].mxu0 }
 0x671   : > { %v2262_v34 = vpack.c.bf16 %v2200_v33, %v2200_v33  ;;  %v5670_v35 = vpop.f32.mrb[37].mxu0  ;;  %v6010_v33 = vld [vmem:[%s7358_s19 + $0x50] sm:$0xff]  }
 0x672   : > { %v2203_v36 = vpop.f32.mrb[38].mxu0  ;;  %5362 = vmatprep.subr.bf16.mxu1 %v6010_v33  ;;  %v6012_v35 = vld [vmem:[%s7358_s19 + $0x58] sm:$0xff]  }
 0x673   : > { %v5671_v37 = vpop.f32.mrb[39].mxu0  ;;  %5693 = vmatmul.mubr.msk.bf16.vlgmr.msra.gmra.mrb[44].mxu0 %vm1825_vm3, %v2262_v34  ;;  %v6011_v34 = vld [vmem:[%s7358_s19 + $0x10] sm:$0xff]   ;;  %v6013_v36 = vld [vmem:[%s7358_s19 + $0x18] sm:$0xff]  }
 0x674   : > { %2603 = vmatprep.mubr.bf16.mxu0 %v6168_v1  ;;  %5363 = vmatpush3.bf16.msra.mxu1 %v6011_v34  ;;  %v6014_v37 = vld [vmem:[%s7358_s19 + $0x60] sm:$0xff]  }
 0x675   : > { %5364 = vmatprep.subr.bf16.mxu1 %v6012_v35 }
 0x678   : > { %5365 = vmatpush3.bf16.msra.mxu1 %v6013_v36 }
 0x679   : > { %5366 = vmatprep.subr.bf16.mxu1 %v6014_v37 }
 0x716   : > { %v2356_v38 = vpop.f32.mrb[44].mxu1 }
 0x717   : > { %v5688_v40 = vpop.f32.mrb[45].mxu1  ;;  %v2461_v50 = vsel %vm803_vm1, %v2356_v38, 0.0  ;;  %v6015_v38 = vld [vmem:[%s7358_s19 + $0x20] sm:$0xff]  }
 0x718   : > { %v2359_v41 = vpop.f32.mrb[46].mxu1  ;;  %5367 = vmatpush3.bf16.msra.mxu1 %v6015_v38  ;;  %v6016_v40 = vld [vmem:[%s7358_s19 + $0x68] sm:$0xff]  }
 0x719   : > { %v5689_v42 = vpop.f32.mrb[47].mxu1  ;;  %v6017_v41 = vld [vmem:[%s7358_s19 + $0x28] sm:$0xff]   ;;  %5368 = vmatprep.subr.bf16.mxu1 %v6016_v40  ;;  %v4989_v40 = vld [vmem:[%s7374_s1 + $0x1] ss:$0 sm:$0xff] }
 0x71a   : > { %v6018_v42 = vld [vmem:[%s7358_s19 + $0x70] sm:$0xff]  }
 0x71c   : > { %5369 = vmatpush3.bf16.msra.mxu1 %v6017_v41 }
 0x71d   : > { %5370 = vmatprep.subr.bf16.mxu1 %v6018_v42  ;;  %v4990_v42 = vld [vmem:[%s7345_s6 + $0x1] ss:$0 sm:$0xff] }
 0x726   : > { %v2454_v43 = vpop.f32.mrb[48].mxu1 }
 0x727   : > { %v5700_v44 = vpop.f32.mrb[49].mxu1  ;;  %v2465_v61 = vsel %vm803_vm1, %v2454_v43, 0.0  ;;  %v6019_v43 = vld [vmem:[%s7358_s19 + $0x30] sm:$0xff]  }
 0x728   : > { %v2457_v47 = vpop.f32.mrb[50].mxu1  ;;  %5371 = vmatpush3.bf16.msra.mxu1 %v6019_v43  ;;  %v6020_v44 = vld [vmem:[%s7358_s19 + $0x78] sm:$0xff]  }
 0x729   : > { %v5701_v49 = vpop.f32.mrb[51].mxu1  ;;  %v6021_v47 = vld [vmem:[%s7358_s19 + $0x38] sm:$0xff]   ;;  %5372 = vmatprep.subr.bf16.mxu1 %v6020_v44 }
 0x72a   : > { %v2518_v49 = vlaneseq }
 0x72c   : > { %5373 = vmatpush3.bf16.msra.mxu1 %v6021_v47  ;;  %v6030_v47 = vld [vmem:[%s7346_s7 + $0xa0] sm:$0xff]  }
 0x72d   : > { %5726 = vmatprep.subr.bf16.mxu1 %v6169_v45 }
 0x736   : > { %v2307_v46 = vpop.f32.mrb[40].mxu0 }
 0x737   : > { %v2460_v51 = vsel %vm803_vm1, %v2307_v46, 0.0  ;;  %v5682_v52 = vpop.f32.mrb[41].mxu0  ;;  %v6839_v46 = vshrl.u32 %v2518_v49, 7  ;;  %v6031_v49 = vld [vmem:[%s7347_s8 + $0x80] sm:$0xff]  }
 0x738   : > { %v2462_v53 = vadd.f32 %v2461_v50, %v2460_v51  ;;  %v2310_v54 = vpop.f32.mrb[42].mxu0  ;;  %v2516_v51 = vld [vmem:[%s7357_s18] sm:$0x3] }
 0x739   : > { %v5683_v55 = vpop.f32.mrb[43].mxu0  ;;  %v2520_v50 = vsub.s32 0, %v6839_v46  ;;  %v2524_v52 = vsub.s32 1, %v6839_v46 }
 0x73b   : > { %v2525_v54 = vrot.slane %v2516_v51, %v2524_v52 }
 0x746   : > { %v2405_v56 = vpop.f32.mrb[44].mxu0 }
 0x747   : > { %v2463_v57 = vsel %vm803_vm1, %v2405_v56, 0.0  ;;  %v5694_v58 = vpop.f32.mrb[45].mxu0 }
 0x748   : > { %v2464_v59 = vadd.f32 %v2463_v57, %v2462_v53  ;;  %v2408_v60 = vpop.f32.mrb[46].mxu0  ;;  %v2521_v53 = vrot.slane %v2516_v51, %v2520_v50 }
 0x749   : > { %v5695_v62 = vpop.f32.mrb[47].mxu0 }
 0x74a   : > { %v2466_v63 = vadd.f32 %v2465_v61, %v2464_v59 }
 0x74c   : > { %v2467_v0 = vadd.f32 %v2466_v63, %v6360_v39  ;;  %v5994_v39 = vld [vmem:[%s7356_s17] ss:$8 sps:$4 sm:$0xff]  }
 0x74d   : > { %2572 = vmatpush1.bf16.msra.mxu0 %v5994_v39 }
 0x74e   : > { %v6748_v2 = vadd.f32 %v4956_v48, %v2467_v0  ;;  %2573 = vmatprep.subr.bf16.mxu0 %v5999_v8 }
 0x750   : > { %v2478_v3 = vsel %vm803_vm1, %v6748_v2, 0.0  ;;  %v2482_v4 = vmul.f32 %v6748_v2, %v6748_v2 }
 0x751   : > { %2479 = vadd.xlane.f32.xlu0 %v2478_v3  ;;  %2574 = vmatpush1.bf16.msra.mxu0 %v5997_v9 }
 0x752   : > { %v2483_v6 = vsel %vm803_vm1, %v2482_v4, 0.0  ;;  %2575 = vmatprep.subr.bf16.mxu0 %v6002_v10 }
 0x753   : > { %2484 = vadd.xlane.f32.xlu1 %v2483_v6 }
 0x755   : > { %2576 = vmatpush1.bf16.msra.mxu0 %v6000_v11 }
 0x756   : > { %2577 = vmatprep.subr.bf16.mxu0 %v6005_v12 }
 0x759   : > { %2578 = vmatpush1.bf16.msra.mxu0 %v6003_v13 }
 0x75a   : > { %5702 = vmatprep.subr.bf16.mxu0 %v6169_v45 }
 0x7de   : > { %v2480_v5 = vpop.xlane.xlu0 %2479 }
 0x7df   : > { %v2481_v14 = vmul.f32 0.015625, %v2480_v5 }
 0x7e0   : > { %v2485_v15 = vpop.xlane.xlu1 %2484 }
 0x7e1   : > { %v2487_v16 = vmul.f32 %v2481_v14, %v2481_v14  ;;  %v2486_v17 = vmul.f32 0.015625, %v2485_v15  ;;  %v2489_v20 = vsub.f32 %v6748_v2, %v2481_v14  ;;  %v4986_v15 = vld [vmem:[%s7359_s20] ss:$0 sm:$0xff] }
 0x7e3   : > { %v2488_v18 = vsub.f32 %v2486_v17, %v2487_v16 }
 0x7e5   : > { %v2490_v19 = vadd.f32 1e-05, %v2488_v18 }
 0x7e7   : > { %6122 = vrsqrt.f32 %v2490_v19 }
 0x7f1   : > { %v6123_v21 = vpop.eup %6122 }
 0x7f2   : > { %v2492_v23 = vmul.f32 %v6123_v21, %v2489_v20 }
 0x7f4   : > { %v2499_v25 = vmul.f32 %v4957_v22, %v2492_v23  ;;  %v6022_v22 = vld [vmem:[%s7346_s7 + $0x80] sm:$0xff]   ;;  %v6024_v23 = vld [vmem:[%s7346_s7 + $0x88] sm:$0xff]  }
 0x7f6   : > { %v2506_v26 = vadd.f32 %v4958_v24, %v2499_v25  ;;  %v6025_v24 = vld [vmem:[%s7346_s7 + $0xc8] sm:$0xff]   ;;  %v6026_v25 = vld [vmem:[%s7346_s7 + $0x90] sm:$0xff]  }
 0x7f8   : > { %v2507_v27 = vpack.c.bf16 %v2506_v26, %v2506_v26  ;;  %v6027_v26 = vld [vmem:[%s7346_s7 + $0xd0] sm:$0xff]  }
 0x7fa   : > { %4967 = vmatmul.mubr.msk.bf16.vlgmr.msra.gmra.mrb[48].mxu0 %vm757_vm0, %v2507_v27  ;;  %v6028_v27 = vld [vmem:[%s7346_s7 + $0x98] sm:$0xff]  }
 0x7fb   : > { %5710 = vmatprep.mubr.msk.bf16.mxu0 %vm6170_vm2, %v6169_v45  ;;  %5703 = vmatpush3.bf16.msra.mxu0 %v6022_v22  ;;  %v6064_v22 = vld [vmem:[%s7348_s9 + $0xb0] sm:$0xff]  }
 0x7fc   : > { %5704 = vmatprep.subr.bf16.mxu0 %v6169_v45 }
 0x7ff   : > { %5705 = vmatpush3.bf16.msra.mxu0 %v6024_v23  ;;  %v6066_v23 = vld [vmem:[%s7348_s9 + $0xe0] sm:$0xff]  }
 0x800   : > { %5706 = vmatprep.subr.bf16.mxu0 %v6169_v45 }
 0x803   : > { %5707 = vmatpush3.bf16.msra.mxu0 %v6026_v25  ;;  %v6068_v25 = vld [vmem:[%s7348_s9 + $0xf0] sm:$0xff]  }
 0x804   : > { %5708 = vmatprep.subr.bf16.mxu0 %v6169_v45 }
 0x807   : > { %5709 = vmatpush3.bf16.msra.mxu0 %v6028_v27 }
 0x808   : > { %5714 = vmatprep.subr.bf16.mxu0 %v6169_v45 }
 0x8cd   : > { %v2605_v55 = vpop.f32.mrb[48].mxu0 }
 0x8ce   : > { %v2606_v56 = vadd.f32 %v2605_v55, %v2521_v53  ;;  %v2607_v57 = vpop.f32.mrb[49].mxu0  ;;  %v6032_v53 = vld [vmem:[%s7346_s7 + $0xa8] sm:$0xff]   ;;  %v6034_v55 = vld [vmem:[%s7346_s7 + $0xb0] sm:$0xff]  }
 0x8cf   : > { %v2608_v58 = vadd.f32 %v2607_v57, %v2525_v54  ;;  %v2609_v59 = vpop.f32.mrb[50].mxu0  ;;  %v6033_v54 = vld [vmem:[%s7347_s8 + $0x88] sm:$0xff]   ;;  %v6036_v57 = vld [vmem:[%s7346_s7 + $0xb8] sm:$0xff]  }
 0x8d0   : > { %v4968_v60 = vmul.f32 -1.702, %v2606_v56  ;;  %v2610_v61 = vpop.f32.mrb[51].mxu0  ;;  %v6038_v59 = vld [vmem:[%s7346_s7 + $0xe0] sm:$0xff]  }
 0x8d1   : > { %v4969_v62 = vmul.f32 -1.702, %v2608_v58  ;;  %v6040_v61 = vld [vmem:[%s7346_s7 + $0xe8] sm:$0xff]  }
 0x8d2   : > { %v2616_v63 = vmul.f32 1.442695, %v4968_v60  ;;  %v6039_v60 = vld [vmem:[%s7347_s8 + $0xc0] sm:$0xff]  }
 0x8d3   : > { %v2618_v48 = vmul.f32 1.442695, %v4969_v62  ;;  %v6041_v62 = vld [vmem:[%s7347_s8 + $0xc8] sm:$0xff]  }
 0x8d4   : > { %6124 = vpow2.f32 %v2616_v63  ;;  %v6042_v63 = vld [vmem:[%s7346_s7 + $0xf0] sm:$0xff]  }
 0x8d5   : > { %6126 = vpow2.f32 %v2618_v48  ;;  %v6043_v48 = vld [vmem:[%s7347_s8 + $0xd0] sm:$0xff]  }
 0x8de   : > { %v6125_v0 = vpop.eup %6124 }
 0x8df   : > { %v6127_v3 = vpop.eup %6126  ;;  %v2620_v4 = vadd.f32 1.0, %v6125_v0  ;;  %v6044_v0 = vld [vmem:[%s7346_s7 + $0xf8] sm:$0xff]  }
 0x8e0   : > { %v2621_v6 = vadd.f32 1.0, %v6127_v3  ;;  %v6045_v3 = vld [vmem:[%s7347_s8 + $0xd8] sm:$0xff]  }
 0x8e1   : > { %6128 = vrcp.f32 %v2620_v4  ;;  %v6046_v4 = vld [vmem:[%s7347_s8 + $0xa0] sm:$0xff]  }
 0x8e2   : > { %6130 = vrcp.f32 %v2621_v6  ;;  %v6047_v6 = vld [vmem:[%s7348_s9 + $0x80] sm:$0xff]  }
 0x8eb   : > { %v6129_v7 = vpop.eup %6128 }
 0x8ec   : > { %v6131_v39 = vpop.eup %6130  ;;  %v2626_v8 = vmul.f32 %v6129_v7, %v2606_v56  ;;  %v6035_v56 = vld [vmem:[%s7347_s8 + $0x90] sm:$0xff]   ;;  %v6048_v7 = vld [vmem:[%s7347_s8 + $0xa8] sm:$0xff]  }
 0x8ed   : > { %v2627_v9 = vmul.f32 %v6131_v39, %v2608_v58  ;;  %v6037_v58 = vld [vmem:[%s7347_s8 + $0x98] sm:$0xff]   ;;  %v6049_v39 = vld [vmem:[%s7348_s9 + $0x88] sm:$0xff]  }
 0x8ee   : > { %v2628_v11 = vpack.c.bf16 %v2626_v8, %v2626_v8  ;;  %v6050_v8 = vld [vmem:[%s7347_s8 + $0xb0] sm:$0xff]  }
 0x8ef   : > { %v2629_v10 = vpack.c.bf16 %v2627_v9, %v2627_v9  ;;  %v6051_v9 = vld [vmem:[%s7348_s9 + $0x90] sm:$0xff]  }
 0x8f1   : > { %2790 = vmatprep.mubr.bf16.mxu1 %v2629_v10  ;;  %v6052_v10 = vld [vmem:[%s7347_s8 + $0xb8] sm:$0xff]  }
 0x8f2   : > { %2791 = vmatmul.mubr.bf16.vlgmr.msra.gmra.mrb[52].mxu1 %v2628_v11  ;;  %v6053_v11 = vld [vmem:[%s7348_s9 + $0x98] sm:$0xff]  }
 0x8f3   : > { %5734 = vmatprep.mubr.msk.bf16.mxu1 %vm6170_vm2, %v6169_v45 }
 0x9c5   : > { %v5374_v12 = vpop.f32.mrb[52].mxu1 }
 0x9c6   : > { %v5375_v13 = vpop.f32.mrb[53].mxu1 }
 0x9c7   : > { %v5376_v5 = vadd.f32 %v5375_v13, %v5374_v12  ;;  %v5377_v14 = vpop.f32.mrb[54].mxu1  ;;  %v6054_v12 = vld [vmem:[%s7347_s8 + $0xe0] sm:$0xff]  }
 0x9c8   : > { %v5378_v16 = vpop.f32.mrb[55].mxu1  ;;  %v6055_v13 = vld [vmem:[%s7348_s9 + $0xc0] sm:$0xff]   ;;  %v6057_v14 = vld [vmem:[%s7348_s9 + $0xc8] sm:$0xff]  }
 0x9c9   : > { %v2798_v17 = vadd.f32 %v5376_v5, %v6748_v2  ;;  %v6023_v2 = vld [vmem:[%s7346_s7 + $0xc0] sm:$0xff]   ;;  %v6056_v5 = vld [vmem:[%s7347_s8 + $0xe8] sm:$0xff]   ;;  %v6059_v16 = vld [vmem:[%s7348_s9 + $0xd0] sm:$0xff]  }
 0x9ca   : > { %5727 = vmatpush3.bf16.msra.mxu1 %v6023_v2  ;;  %v6065_v2 = vld [vmem:[%s7348_s9 + $0xb8] sm:$0xff]  }
 0x9cb   : > { %v6856_v18 = vadd.f32 %v4986_v15, %v2798_v17  ;;  %5728 = vmatprep.subr.bf16.mxu1 %v6169_v45  ;;  %v6058_v15 = vld [vmem:[%s7347_s8 + $0xf0] sm:$0xff]   ;;  %v6060_v17 = vld [vmem:[%s7347_s8 + $0xf8] sm:$0xff]  }
 0x9cd   : > { %v2811_v19 = vsel %vm803_vm1, %v6856_v18, 0.0  ;;  %v2815_v20 = vmul.f32 %v6856_v18, %v6856_v18 }
 0x9ce   : > { %2812 = vadd.xlane.f32.xlu0 %v2811_v19  ;;  %5729 = vmatpush3.bf16.msra.mxu1 %v6025_v24  ;;  %v6061_v19 = vld [vmem:[%s7348_s9 + $0xd8] sm:$0xff]   ;;  %v6067_v24 = vld [vmem:[%s7348_s9 + $0xe8] sm:$0xff]  }
 0x9cf   : > { %v2816_v21 = vsel %vm803_vm1, %v2815_v20, 0.0  ;;  %5730 = vmatprep.subr.bf16.mxu1 %v6169_v45  ;;  %v6062_v20 = vld [vmem:[%s7348_s9 + $0xa0] sm:$0xff]  }
 0x9d0   : > { %2817 = vadd.xlane.f32.xlu1 %v2816_v21  ;;  %v6063_v21 = vld [vmem:[%s7348_s9 + $0xa8] sm:$0xff]  }
 0x9d2   : > { %5731 = vmatpush3.bf16.msra.mxu1 %v6027_v26  ;;  %v6069_v26 = vld [vmem:[%s7348_s9 + $0xf8] sm:$0xff]  }
 0x9d3   : > { %5732 = vmatprep.subr.bf16.mxu1 %v6169_v45 }
 0x9d6   : > { %5733 = vmatpush3.bf16.msra.mxu1 %v6029_v28 }
 0x9d7   : > { %5750 = vmatprep.subr.bf16.mxu1 %v6169_v45 }
 0xa5b   : > { %v2813_v29 = vpop.xlane.xlu0 %2812 }
 0xa5c   : > { %v2814_v30 = vmul.f32 0.015625, %v2813_v29 }
 0xa5d   : > { %v2818_v32 = vpop.xlane.xlu1 %2817 }
 0xa5e   : > { %v2820_v33 = vmul.f32 %v2814_v30, %v2814_v30  ;;  %v2819_v34 = vmul.f32 0.015625, %v2818_v32  ;;  %v2822_v37 = vsub.f32 %v6856_v18, %v2814_v30 }
 0xa60   : > { %v2821_v35 = vsub.f32 %v2819_v34, %v2820_v33 }
 0xa62   : > { %v2823_v36 = vadd.f32 1e-05, %v2821_v35 }
 0xa64   : > { %6132 = vrsqrt.f32 %v2823_v36  ;;  %v5087_v36 = vld [vmem:[%s7350_s11 + $0x4] ss:$0 sm:$0xff] }
 0xa6e   : > { %v6133_v38 = vpop.eup %6132 }
 0xa6f   : > { %v2825_v41 = vmul.f32 %v6133_v38, %v2822_v37 }
 0xa71   : > { %v2832_v43 = vmul.f32 %v4989_v40, %v2825_v41 }
 0xa73   : > { %v2839_v44 = vadd.f32 %v4990_v42, %v2832_v43 }
 0xa75   : > { %v6908_v51 = vpack.c.bf16 %v2839_v44, %v2839_v44 }
 0xa77   : > { %5711 = vmatmul.mubr.msk.bf16.vlgmr.msra.gmra.mrb[52].mxu0 %vm757_vm0, %v6908_v51  ;;  %5735 = vmatmul.mubr.msk.bf16.vlgmr.msra.gmra.mrb[56].mxu1 %vm757_vm0, %v6908_v51 }
 0xa78   : > { %5715 = vmatpush3.bf16.msra.mxu0 %v6030_v47  ;;  %5751 = vmatpush3.bf16.msra.mxu1 %v6031_v49 }
 0xa79   : > { %5716 = vmatprep.subr.bf16.mxu0 %v6169_v45  ;;  %5752 = vmatprep.subr.bf16.mxu1 %v6169_v45 }
 0xa7a   : > { %5722 = vmatprep.mubr.msk.bf16.mxu0 %vm6170_vm2, %v6169_v45  ;;  %5758 = vmatprep.mubr.msk.bf16.mxu1 %vm6170_vm2, %v6169_v45 }
 0xa7c   : > { %5717 = vmatpush3.bf16.msra.mxu0 %v6032_v53  ;;  %5753 = vmatpush3.bf16.msra.mxu1 %v6033_v54  ;;  %v5027_v53 = vld [vmem:[%s7349_s10 + $0x4] ss:$0 sm:$0xff] }
 0xa7d   : > { %5718 = vmatprep.subr.bf16.mxu0 %v6169_v45  ;;  %5754 = vmatprep.subr.bf16.mxu1 %v6169_v45 }
 0xa80   : > { %5719 = vmatpush3.bf16.msra.mxu0 %v6034_v55  ;;  %5755 = vmatpush3.bf16.msra.mxu1 %v6035_v56 }
 0xa81   : > { %5720 = vmatprep.subr.bf16.mxu0 %v6169_v45  ;;  %5756 = vmatprep.subr.bf16.mxu1 %v6169_v45 }
 0xa84   : > { %5721 = vmatpush3.bf16.msra.mxu0 %v6036_v57  ;;  %5757 = vmatpush3.bf16.msra.mxu1 %v6037_v58  ;;  %v5089_v57 = vld [vmem:[%s7350_s11 + $0x6] ss:$0 sm:$0xff] }
 0xa85   : > { %5738 = vmatprep.subr.bf16.mxu0 %v6169_v45  ;;  %5774 = vmatprep.subr.bf16.mxu1 %v6169_v45 }
 0xa87   : > { %5723 = vmatmul.mubr.msk.bf16.vlgmr.msra.gmra.mrb[56].mxu0 %vm757_vm0, %v6908_v51  ;;  %5759 = vmatmul.mubr.msk.bf16.vlgmr.msra.gmra.mrb[60].mxu1 %vm757_vm0, %v6908_v51 }
 0xa88   : > { %5739 = vmatpush3.bf16.msra.mxu0 %v6038_v59  ;;  %5775 = vmatpush3.bf16.msra.mxu1 %v6039_v60 }
 0xa89   : > { %5740 = vmatprep.subr.bf16.mxu0 %v6169_v45  ;;  %5776 = vmatprep.subr.bf16.mxu1 %v6169_v45 }
 0xa8a   : > { %5746 = vmatprep.mubr.msk.bf16.mxu0 %vm6170_vm2, %v6169_v45  ;;  %5782 = vmatprep.mubr.msk.bf16.mxu1 %vm6170_vm2, %v6169_v45 }
 0xa8c   : > { %5741 = vmatpush3.bf16.msra.mxu0 %v6040_v61  ;;  %5777 = vmatpush3.bf16.msra.mxu1 %v6041_v62 }
 0xa8d   : > { %5742 = vmatprep.subr.bf16.mxu0 %v6169_v45  ;;  %5778 = vmatprep.subr.bf16.mxu1 %v6169_v45 }
 0xa90   : > { %5743 = vmatpush3.bf16.msra.mxu0 %v6042_v63  ;;  %5779 = vmatpush3.bf16.msra.mxu1 %v6043_v48 }
 0xa91   : > { %5744 = vmatprep.subr.bf16.mxu0 %v6169_v45  ;;  %5780 = vmatprep.subr.bf16.mxu1 %v6169_v45 }
 0xa94   : > { %5745 = vmatpush3.bf16.msra.mxu0 %v6044_v0  ;;  %5781 = vmatpush3.bf16.msra.mxu1 %v6045_v3 }
 0xa95   : > { %5762 = vmatprep.subr.bf16.mxu0 %v6169_v45  ;;  %5798 = vmatprep.subr.bf16.mxu1 %v6169_v45 }
 0xa97   : > { %5747 = vmatmul.mubr.msk.bf16.vlgmr.msra.gmra.mrb[60].mxu0 %vm757_vm0, %v6908_v51  ;;  %5783 = vmatmul.mubr.msk.bf16.vlgmr.msra.gmra.mrb[64].mxu1 %vm757_vm0, %v6908_v51 }
 0xa98   : > { %5763 = vmatpush3.bf16.msra.mxu0 %v6046_v4  ;;  %5799 = vmatpush3.bf16.msra.mxu1 %v6047_v6  ;;  %v5029_v6 = vld [vmem:[%s7349_s10 + $0x6] ss:$0 sm:$0xff] }
 0xa99   : > { %5764 = vmatprep.subr.bf16.mxu0 %v6169_v45  ;;  %5800 = vmatprep.subr.bf16.mxu1 %v6169_v45 }
 0xa9a   : > { %5770 = vmatprep.mubr.msk.bf16.mxu0 %vm6170_vm2, %v6169_v45  ;;  %5806 = vmatprep.mubr.msk.bf16.mxu1 %vm6170_vm2, %v6169_v45 }
 0xa9c   : > { %5765 = vmatpush3.bf16.msra.mxu0 %v6048_v7  ;;  %5801 = vmatpush3.bf16.msra.mxu1 %v6049_v39 }
 0xa9d   : > { %5766 = vmatprep.subr.bf16.mxu0 %v6169_v45  ;;  %5802 = vmatprep.subr.bf16.mxu1 %v6169_v45 }
 0xaa0   : > { %5767 = vmatpush3.bf16.msra.mxu0 %v6050_v8  ;;  %5803 = vmatpush3.bf16.msra.mxu1 %v6051_v9  ;;  %v5088_v9 = vld [vmem:[%s7350_s11 + $0x5] ss:$0 sm:$0xff] }
 0xaa1   : > { %5768 = vmatprep.subr.bf16.mxu0 %v6169_v45  ;;  %5804 = vmatprep.subr.bf16.mxu1 %v6169_v45 }
 0xaa4   : > { %5769 = vmatpush3.bf16.msra.mxu0 %v6052_v10  ;;  %5805 = vmatpush3.bf16.msra.mxu1 %v6053_v11  ;;  %v5147_v10 = vld [vmem:[%s7351_s12 + $0x4] ss:$0 sm:$0xff] }
 0xaa5   : > { %5786 = vmatprep.subr.bf16.mxu0 %v6169_v45  ;;  %5822 = vmatprep.subr.bf16.mxu1 %v6169_v45 }
 0xaa7   : > { %5771 = vmatmul.mubr.msk.bf16.vlgmr.msra.gmra.mrb[64].mxu0 %vm757_vm0, %v6908_v51  ;;  %5807 = vmatmul.mubr.msk.bf16.vlgmr.msra.gmra.mrb[68].mxu1 %vm757_vm0, %v6908_v51 }
 0xaa8   : > { %5787 = vmatpush3.bf16.msra.mxu0 %v6054_v12  ;;  %5823 = vmatpush3.bf16.msra.mxu1 %v6055_v13 }
 0xaa9   : > { %5788 = vmatprep.subr.bf16.mxu0 %v6169_v45  ;;  %5824 = vmatprep.subr.bf16.mxu1 %v6169_v45 }
 0xaaa   : > { %5794 = vmatprep.mubr.msk.bf16.mxu0 %vm6170_vm2, %v6169_v45  ;;  %5830 = vmatprep.mubr.msk.bf16.mxu1 %vm6170_vm2, %v6169_v45 }
 0xaac   : > { %5789 = vmatpush3.bf16.msra.mxu0 %v6056_v5  ;;  %5825 = vmatpush3.bf16.msra.mxu1 %v6057_v14 }
 0xaad   : > { %5790 = vmatprep.subr.bf16.mxu0 %v6169_v45  ;;  %5826 = vmatprep.subr.bf16.mxu1 %v6169_v45 }
 0xab0   : > { %5791 = vmatpush3.bf16.msra.mxu0 %v6058_v15  ;;  %5827 = vmatpush3.bf16.msra.mxu1 %v6059_v16 }
 0xab1   : > { %5792 = vmatprep.subr.bf16.mxu0 %v6169_v45  ;;  %5828 = vmatprep.subr.bf16.mxu1 %v6169_v45 }
 0xab4   : > { %5793 = vmatpush3.bf16.msra.mxu0 %v6060_v17  ;;  %5829 = vmatpush3.bf16.msra.mxu1 %v6061_v19 }
 0xab5   : > { %5810 = vmatprep.subr.bf16.mxu0 %v6169_v45  ;;  %5846 = vmatprep.subr.bf16.mxu1 %v6169_v45 }
 0xab7   : > { %5795 = vmatmul.mubr.msk.bf16.vlgmr.msra.gmra.mrb[68].mxu0 %vm757_vm0, %v6908_v51  ;;  %5831 = vmatmul.mubr.msk.bf16.vlgmr.msra.gmra.mrb[72].mxu1 %vm757_vm0, %v6908_v51 }
 0xab8   : > { %5811 = vmatpush3.bf16.msra.mxu0 %v6062_v20  ;;  %5818 = vmatprep.mubr.msk.bf16.mxu0 %vm6170_vm2, %v6169_v45 }
 0xab9   : > { %5812 = vmatprep.subr.bf16.mxu0 %v6169_v45  ;;  %5848 = vmatprep.mubr.msk.bf16.mxu1 %vm6170_vm2, %v6169_v45 }
 0xabc   : > { %5813 = vmatpush3.bf16.msra.mxu0 %v6063_v21 }
 0xabd   : > { %5814 = vmatprep.subr.bf16.mxu0 %v6169_v45 }
 0xac0   : > { %5815 = vmatpush3.bf16.msra.mxu0 %v6064_v22 }
 0xac1   : > { %5816 = vmatprep.subr.bf16.mxu0 %v6169_v45 }
 0xac4   : > { %5817 = vmatpush3.bf16.msra.mxu0 %v6065_v2  ;;  %v5028_v2 = vld [vmem:[%s7349_s10 + $0x5] ss:$0 sm:$0xff] }
 0xac5   : > { %5834 = vmatprep.subr.bf16.mxu0 %v6169_v45 }
 0xac7   : > { %5819 = vmatmul.mubr.msk.bf16.vlgmr.msra.gmra.mrb[72].mxu0 %vm757_vm0, %v6908_v51 }
 0xac8   : > { %5835 = vmatpush3.bf16.msra.mxu0 %v6066_v23  ;;  %5842 = vmatprep.mubr.msk.bf16.mxu0 %vm6170_vm2, %v6169_v45 }
 0xac9   : > { %5836 = vmatprep.subr.bf16.mxu0 %v6169_v45 }
 0xacc   : > { %5837 = vmatpush3.bf16.msra.mxu0 %v6067_v24 }
 0xacd   : > { %5838 = vmatprep.subr.bf16.mxu0 %v6169_v45 }
 0xad0   : > { %5839 = vmatpush3.bf16.msra.mxu0 %v6068_v25 }
 0xad1   : > { %5840 = vmatprep.subr.bf16.mxu0 %v6169_v45 }
 0xad4   : > { %5841 = vmatpush3.bf16.msra.mxu0 %v6069_v26 }
 0xad5   : > { %5858 = vmatprep.subr.bf16.mxu0 %v6169_v45 }
 0xad7   : > { %5843 = vmatmul.mubr.msk.bf16.vlgmr.msra.gmra.mrb[76].mxu0 %vm757_vm0, %v6908_v51 }
 0xad8   : > { %5860 = vmatprep.mubr.msk.bf16.mxu0 %vm6170_vm2, %v6169_v45 }
 0xb4a   : > { %v2964_v27 = vpop.f32.mrb[52].mxu0  ;;  %v3092_v28 = vpop.f32.mrb[56].mxu1 }
 0xb4b   : > { %v5712_v29 = vpop.f32.mrb[53].mxu0  ;;  %v5736_v30 = vpop.f32.mrb[57].mxu1  ;;  %v2965_v55 = vadd.f32 %v5027_v53, %v2964_v27  ;;  %v3093_v39 = vadd.f32 %v5029_v6, %v3092_v28  ;;  %v5090_v27 = vld [vmem:[%s7350_s11 + $0x7] ss:$0 sm:$0xff] }
 0xb4c   : > { %v2967_v32 = vpop.f32.mrb[54].mxu0  ;;  %v3095_v33 = vpop.f32.mrb[58].mxu1 }
 0xb4d   : > { %v5713_v34 = vpop.f32.mrb[55].mxu0  ;;  %v5737_v35 = vpop.f32.mrb[59].mxu1  ;;  %v3798_v56 = vpack.c.bf16 %v2965_v55, %v2965_v55  ;;  %v3800_v8 = vpack.c.bf16 %v3093_v39, %v3093_v39 }
 0xb5a   : > { %v3028_v37 = vpop.f32.mrb[56].mxu0  ;;  %v3282_v38 = vpop.f32.mrb[60].mxu1 }
 0xb5b   : > { %v3283_v40 = vadd.f32 %v5087_v36, %v3282_v38  ;;  %v5724_v41 = vpop.f32.mrb[57].mxu0  ;;  %v5760_v42 = vpop.f32.mrb[61].mxu1  ;;  %v3029_v25 = vadd.f32 %v5028_v2, %v3028_v37 }
 0xb5c   : > { %v3031_v43 = vpop.f32.mrb[58].mxu0  ;;  %v3285_v44 = vpop.f32.mrb[62].mxu1 }
 0xb5d   : > { %v3802_v47 = vpack.c.bf16 %v3283_v40, %v3283_v40  ;;  %v5725_v49 = vpop.f32.mrb[59].mxu0  ;;  %v5761_v51 = vpop.f32.mrb[63].mxu1  ;;  %v3799_v26 = vpack.c.bf16 %v3029_v25, %v3029_v25  ;;  %v5030_v40 = vld [vmem:[%s7349_s10 + $0x7] ss:$0 sm:$0xff]  ;;  %v5148_v44 = vld [vmem:[%s7351_s12 + $0x5] ss:$0 sm:$0xff] }
 0xb5f   : > { %v3810_v54 = vsel %vm1825_vm3, %v3802_v47, 0 }
 0xb60   : > { %5847 = vmatpush3.bf16.xpose.msra.mxu1 %v3810_v54 }
 0xb61   : > { %5852 = vmatprep.subr.bf16.mxu1 %v6169_v45 }
 0xb67   : > { %5849 = vmatmul.mubr.msk.bf16.vlgmr.msra.gmra.mrb[76].mxu1 %vm1825_vm3, %v3798_v56 }
 0xb68   : > { %5854 = vmatprep.mubr.msk.bf16.mxu1 %vm6170_vm2, %v6169_v45 }
 0xb6a   : > { %v3156_v58 = vpop.f32.mrb[60].mxu0  ;;  %v3410_v59 = vpop.f32.mrb[64].mxu1 }
 0xb6b   : > { %v3411_v60 = vadd.f32 %v5089_v57, %v3410_v59  ;;  %v5748_v61 = vpop.f32.mrb[61].mxu0  ;;  %v5784_v62 = vpop.f32.mrb[65].mxu1  ;;  %v3157_v42 = vadd.f32 %v5030_v40, %v3156_v58 }
 0xb6c   : > { %v3159_v63 = vpop.f32.mrb[62].mxu0  ;;  %v3413_v48 = vpop.f32.mrb[66].mxu1 }
 0xb6d   : > { %v3804_v0 = vpack.c.bf16 %v3411_v60, %v3411_v60  ;;  %v5749_v3 = vpop.f32.mrb[63].mxu0  ;;  %v5785_v4 = vpop.f32.mrb[67].mxu1  ;;  %v3801_v43 = vpack.c.bf16 %v3157_v42, %v3157_v42 }
 0xb6f   : > { %v3902_v7 = vsel %vm1825_vm3, %v3804_v0, 0 }
 0xb70   : > { %5859 = vmatpush3.bf16.xpose.msra.mxu0 %v3902_v7 }
 0xb71   : > { %5870 = vmatprep.subr.bf16.mxu0 %v6169_v45 }
 0xb77   : > { %5861 = vmatmul.mubr.msk.bf16.vlgmr.msra.gmra.mrb[80].mxu0 %vm1825_vm3, %v3800_v8 }
 0xb78   : > { %5872 = vmatprep.mubr.msk.bf16.mxu0 %vm6170_vm2, %v6169_v45 }
 0xb7a   : > { %v3346_v11 = vpop.f32.mrb[64].mxu0  ;;  %v3600_v12 = vpop.f32.mrb[68].mxu1 }
 0xb7b   : > { %v3347_v13 = vadd.f32 %v5088_v9, %v3346_v11  ;;  %v3601_v5 = vadd.f32 %v5147_v10, %v3600_v12  ;;  %v5772_v14 = vpop.f32.mrb[65].mxu0  ;;  %v5808_v15 = vpop.f32.mrb[69].mxu1 }
 0xb7c   : > { %v3349_v16 = vpop.f32.mrb[66].mxu0  ;;  %v3603_v17 = vpop.f32.mrb[70].mxu1 }
 0xb7d   : > { %v3803_v19 = vpack.c.bf16 %v3347_v13, %v3347_v13  ;;  %v4038_v20 = vpack.c.bf16 %v3601_v5, %v3601_v5  ;;  %v5773_v21 = vpop.f32.mrb[67].mxu0  ;;  %v5809_v22 = vpop.f32.mrb[71].mxu1 }
 0xb7f   : > { %v3856_v23 = vsel %vm1825_vm3, %v3803_v19, 0  ;;  %v4046_v24 = vand.u32 %v4038_v20, %v6652_v31 }
 0xb80   : > { %5853 = vmatpush3.bf16.xpose.msra.mxu1 %v3856_v23 }
 0xb81   : > { %5871 = vmatpush3.bf16.msra.mxu0 %v4046_v24  ;;  %5864 = vmatprep.subr.bf16.mxu1 %v6169_v45 }
 0xb82   : > { %5882 = vmatprep.subr.bf16.mxu0 %v6169_v45 }
 0xb87   : > { %5855 = vmatmul.mubr.msk.bf16.vlgmr.msra.gmra.mrb[80].mxu1 %vm1825_vm3, %v3799_v26 }
 0xb88   : > { %5866 = vmatprep.mubr.msk.bf16.mxu1 %vm6170_vm2, %v6169_v45 }
 0xb8a   : > { %v3474_v28 = vpop.f32.mrb[68].mxu0  ;;  %v7153_v29 = vpop.f32.mrb[72].mxu1 }
 0xb8b   : > { %v3475_v30 = vadd.f32 %v5090_v27, %v3474_v28  ;;  %v5796_v32 = vpop.f32.mrb[69].mxu0  ;;  %v5832_v33 = vpop.f32.mrb[73].mxu1 }
 0xb8c   : > { %v3477_v34 = vpop.f32.mrb[70].mxu0  ;;  %v3731_v35 = vpop.f32.mrb[74].mxu1 }
 0xb8d   : > { %v3805_v36 = vpack.c.bf16 %v3475_v30, %v3475_v30  ;;  %v5797_v37 = vpop.f32.mrb[71].mxu0  ;;  %v5833_v38 = vpop.f32.mrb[75].mxu1 }
 0xb8f   : > { %v3948_v41 = vsel %vm1825_vm3, %v3805_v36, 0 }
 0xb90   : > { %5865 = vmatpush3.bf16.xpose.msra.mxu1 %v3948_v41  ;;  %v5149_v41 = vld [vmem:[%s7351_s12 + $0x6] ss:$0 sm:$0xff] }
 0xb91   : > { %5876 = vmatprep.subr.bf16.mxu1 %v6169_v45  ;;  %v3729_v42 = vadd.f32 %v5149_v41, %v7153_v29 }
 0xb97   : > { %5867 = vmatmul.mubr.msk.bf16.vlgmr.msra.gmra.mrb[84].mxu1 %vm1825_vm3, %v3801_v43 }
 0xb98   : > { %5878 = vmatprep.mubr.msk.bf16.mxu1 %vm6170_vm2, %v6169_v45 }
 0xb9a   : > { %v3664_v47 = vpop.f32.mrb[72].mxu0 }
 0xb9b   : > { %v3665_v49 = vadd.f32 %v5148_v44, %v3664_v47  ;;  %v5820_v51 = vpop.f32.mrb[73].mxu0  ;;  %v4040_v44 = vpack.c.bf16 %v3729_v42, %v3729_v42 }
 0xb9c   : > { %v3667_v53 = vpop.f32.mrb[74].mxu0 }
 0xb9d   : > { %v4039_v54 = vpack.c.bf16 %v3665_v49, %v3665_v49  ;;  %v5821_v55 = vpop.f32.mrb[75].mxu0  ;;  %v4138_v51 = vand.u32 %v4040_v44, %v6652_v31 }
 0xb9f   : > { %v4092_v56 = vand.u32 %v4039_v54, %v6652_v31 }
 0xba1   : > { %5877 = vmatpush3.bf16.msra.mxu1 %v4092_v56 }
 0xba2   : > { %5888 = vmatprep.subr.bf16.mxu1 %v6169_v45 }
 0xbaa   : > { %v7168_v57 = vpop.f32.mrb[76].mxu0 }
 0xbab   : > { %v5844_v58 = vpop.f32.mrb[77].mxu0 }
 0xbac   : > { %v3795_v59 = vpop.f32.mrb[78].mxu0  ;;  %v5150_v58 = vld [vmem:[%s7351_s12 + $0x7] ss:$0 sm:$0xff] }
 0xbad   : > { %v5845_v60 = vpop.f32.mrb[79].mxu0  ;;  %v3793_v59 = vadd.f32 %v5150_v58, %v7168_v57  ;;  %v6072_v57 = vld [vmem:[%s7352_s13 + $0x28] sm:$0xff]  }
 0xc3a   : > { %v3846_v61 = vpop.f32.mrb[76].mxu1 }
 0xc3b   : > { %v5850_v62 = vpop.f32.mrb[77].mxu1  ;;  %v3990_v63 = vsel %vm2010_vm6, %v3846_v61, -inf }
 0xc3c   : > { %3991 = vmax.xlane.f32.xlu0 %v3990_v63  ;;  %v3849_v48 = vpop.f32.mrb[78].mxu1 }
 0xc3d   : > { %v5851_v0 = vpop.f32.mrb[79].mxu1 }
 0xc4a   : > { %v3938_v3 = vpop.f32.mrb[80].mxu0 }
 0xc4b   : > { %v5862_v4 = vpop.f32.mrb[81].mxu0  ;;  %v3996_v6 = vsel %vm2010_vm6, %v3938_v3, -inf }
 0xc4c   : > { %3997 = vmax.xlane.f32.xlu0 %v3996_v6  ;;  %v3941_v7 = vpop.f32.mrb[82].mxu0 }
 0xc4d   : > { %v5863_v39 = vpop.f32.mrb[83].mxu0 }
 0xc4e   : > { %v6071_v39 = vld [vmem:[%s7352_s13 + $0x30] sm:$0xff]  }
 0xc5a   : > { %v3892_v8 = vpop.f32.mrb[80].mxu1 }
 0xc5b   : > { %v5856_v9 = vpop.f32.mrb[81].mxu1  ;;  %v3993_v10 = vsel %vm2010_vm6, %v3892_v8, -inf }
 0xc5c   : > { %3994 = vmax.xlane.f32.xlu1 %v3993_v10  ;;  %v3895_v11 = vpop.f32.mrb[82].mxu1 }
 0xc5d   : > { %v5857_v12 = vpop.f32.mrb[83].mxu1 }
 0xc6a   : > { %v3984_v13 = vpop.f32.mrb[84].mxu1 }
 0xc6b   : > { %v5868_v5 = vpop.f32.mrb[85].mxu1  ;;  %v3999_v14 = vsel %vm2010_vm6, %v3984_v13, -inf }
 0xc6c   : > { %4000 = vmax.xlane.f32.xlu1 %v3999_v14  ;;  %v3987_v15 = vpop.f32.mrb[86].mxu1 }
 0xc6d   : > { %v5869_v16 = vpop.f32.mrb[87].mxu1 }
 0xcc9   : > { %v3992_v17 = vpop.xlane.xlu0 %3991 }
 0xcca   : > { %v4002_v19 = vsub.f32 %v3846_v61, %v3992_v17  ;;  %v4041_v61 = vpack.c.bf16 %v3793_v59, %v3793_v59  ;;  %v6073_v17 = vld [vmem:[%s7352_s13 + $0x38] sm:$0xff]  }
 0xccc   : > { %v4006_v20 = vmul.f32 1.442695, %v4002_v19  ;;  %v4184_v48 = vand.u32 %v4041_v61, %v6652_v31  ;;  %v6070_v31 = vld [vmem:[%s7352_s13 + $0x20] sm:$0xff]  }
 0xcce   : > { %6134 = vpow2.f32 %v4006_v20 }
 0xcd8   : > { %v6135_v21 = vpop.eup %6134 }
 0xcd9   : > { %v3998_v22 = vpop.xlane.xlu0 %3997  ;;  %v4014_v2 = vsel %vm2010_vm6, %v6135_v21, 0.0 }
 0xcda   : > { %v4004_v23 = vsub.f32 %v3938_v3, %v3998_v22  ;;  %4015 = vadd.xlane.f32.xlu0 %v4014_v2 }
 0xcdc   : > { %v4010_v24 = vmul.f32 1.442695, %v4004_v23 }
 0xcde   : > { %6136 = vpow2.f32 %v4010_v24 }
 0xce8   : > { %v6137_v25 = vpop.eup %6136 }
 0xce9   : > { %v3995_v26 = vpop.xlane.xlu1 %3994  ;;  %v4020_v27 = vsel %vm2010_vm6, %v6137_v25, 0.0 }
 0xcea   : > { %v4003_v28 = vsub.f32 %v3892_v8, %v3995_v26  ;;  %4021 = vadd.xlane.f32.xlu0 %v4020_v27 }
 0xcec   : > { %v4008_v30 = vmul.f32 1.442695, %v4003_v28 }
 0xcee   : > { %6138 = vpow2.f32 %v4008_v30 }
 0xcf8   : > { %v6139_v32 = vpop.eup %6138 }
 0xcf9   : > { %v4001_v33 = vpop.xlane.xlu1 %4000  ;;  %v4017_v34 = vsel %vm2010_vm6, %v6139_v32, 0.0 }
 0xcfa   : > { %v4005_v35 = vsub.f32 %v3984_v13, %v4001_v33  ;;  %4018 = vadd.xlane.f32.xlu1 %v4017_v34 }
 0xcfc   : > { %v4012_v36 = vmul.f32 1.442695, %v4005_v35 }
 0xcfe   : > { %6140 = vpow2.f32 %v4012_v36 }
 0xd08   : > { %v6141_v37 = vpop.eup %6140 }
 0xd09   : > { %v4023_v38 = vsel %vm2010_vm6, %v6141_v37, 0.0 }
 0xd0a   : > { %4024 = vadd.xlane.f32.xlu1 %v4023_v38 }
 0xd67   : > { %v4016_v40 = vpop.xlane.xlu0 %4015 }
 0xd68   : > { %6142 = vrcp.f32 %v4016_v40 }
 0xd72   : > { %v6143_v43 = vpop.eup %6142 }
 0xd73   : > { %v4030_v47 = vmul.f32 %v6143_v43, %v6135_v21 }
 0xd75   : > { %v4034_v49 = vpack.c.bf16 %v4030_v47, %v4030_v47 }
 0xd77   : > { %5873 = vmatmul.mubr.msk.bf16.vlgmr.msra.gmra.mrb[84].mxu0 %vm2063_vm7, %v4034_v49  ;;  %v4022_v53 = vpop.xlane.xlu0 %4021 }
 0xd78   : > { %5883 = vmatpush3.bf16.msra.mxu0 %v4138_v51  ;;  %6144 = vrcp.f32 %v4022_v53  ;;  %5884 = vmatprep.mubr.msk.bf16.mxu0 %vm6170_vm2, %v6169_v45 }
 0xd79   : > { %5894 = vmatprep.subr.bf16.mxu0 %v6169_v45 }
 0xd82   : > { %v6145_v54 = vpop.eup %6144 }
 0xd83   : > { %v4032_v55 = vmul.f32 %v6145_v54, %v6137_v25 }
 0xd85   : > { %v4036_v56 = vpack.c.bf16 %v4032_v55, %v4032_v55  ;;  %v5196_v55 = vld [vmem:[%s7353_s14 + $0x1] ss:$0 sm:$0xff] }
 0xd87   : > { %v4019_v29 = vpop.xlane.xlu1 %4018  ;;  %5885 = vmatmul.mubr.msk.bf16.vlgmr.msra.gmra.mrb[88].mxu0 %vm2063_vm7, %v4036_v56 }
 0xd88   : > { %6146 = vrcp.f32 %v4019_v29  ;;  %5896 = vmatprep.mubr.msk.bf16.mxu0 %vm6170_vm2, %v6169_v45  ;;  %5895 = vmatpush3.bf16.msra.mxu0 %v6070_v31 }
 0xd89   : > { %5906 = vmatprep.subr.bf16.mxu0 %v6169_v45 }
 0xd92   : > { %v6147_v60 = vpop.eup %6146 }
 0xd93   : > { %v4031_v62 = vmul.f32 %v6147_v60, %v6139_v32 }
 0xd95   : > { %v4035_v63 = vpack.c.bf16 %v4031_v62, %v4031_v62  ;;  %v6076_v62 = vld [vmem:[%s7356_s17 + $0x44] ss:$8 sps:$4 sm:$0xff]  }
 0xd97   : > { %v4025_v0 = vpop.xlane.xlu1 %4024  ;;  %5879 = vmatmul.mubr.msk.bf16.vlgmr.msra.gmra.mrb[88].mxu1 %vm2063_vm7, %v4035_v63  ;;  %v6079_v63 = vld [vmem:[%s7356_s17 + $0x54] ss:$8 sps:$4 sm:$0xff]  }
 0xd98   : > { %6148 = vrcp.f32 %v4025_v0  ;;  %5889 = vmatpush3.bf16.msra.mxu1 %v4184_v48  ;;  %5890 = vmatprep.mubr.msk.bf16.mxu1 %vm6170_vm2, %v6169_v45  ;;  %v6077_v48 = vld [vmem:[%s7356_s17 + $0x50] ss:$8 sps:$4 sm:$0xff]   ;;  %v6082_v0 = vld [vmem:[%s7356_s17 + $0x64] ss:$8 sps:$4 sm:$0xff]  }
 0xd99   : > { %5900 = vmatprep.subr.bf16.mxu1 %v6169_v45 }
 0xda2   : > { %v6149_v3 = vpop.eup %6148 }
 0xda3   : > { %v4033_v4 = vmul.f32 %v6149_v3, %v6141_v37  ;;  %v6080_v3 = vld [vmem:[%s7356_s17 + $0x60] ss:$8 sps:$4 sm:$0xff]  }
 0xda5   : > { %v4037_v6 = vpack.c.bf16 %v4033_v4, %v4033_v4  ;;  %v6085_v4 = vld [vmem:[%s7356_s17 + $0x74] ss:$8 sps:$4 sm:$0xff]  }
 0xda7   : > { %5891 = vmatmul.mubr.msk.bf16.vlgmr.msra.gmra.mrb[92].mxu1 %vm2063_vm7, %v4037_v6  ;;  %v6083_v6 = vld [vmem:[%s7356_s17 + $0x70] ss:$8 sps:$4 sm:$0xff]  }
 0xda8   : > { %5902 = vmatprep.mubr.msk.bf16.mxu1 %vm6170_vm2, %v6169_v45  ;;  %5901 = vmatpush3.bf16.msra.mxu1 %v6072_v57 }
 0xda9   : > { %5912 = vmatprep.subr.bf16.mxu1 %v6169_v45 }
 0xe4a   : > { %v4082_v7 = vpop.f32.mrb[84].mxu0 }
 0xe4b   : > { %v4235_v8 = vpack.c.bf16 %v4082_v7, %v4082_v7  ;;  %v5874_v9 = vpop.f32.mrb[85].mxu0 }
 0xe4c   : > { %v4085_v10 = vpop.f32.mrb[86].mxu0 }
 0xe4d   : > { %v5875_v11 = vpop.f32.mrb[87].mxu0  ;;  %5897 = vmatmul.mubr.msk.bf16.vlgmr.msra.gmra.mrb[92].mxu0 %vm1825_vm3, %v4235_v8 }
 0xe4e   : > { %5907 = vmatpush3.bf16.msra.mxu0 %v6071_v39  ;;  %5908 = vmatprep.mubr.msk.bf16.mxu0 %vm6170_vm2, %v6169_v45 }
 0xe4f   : > { %4551 = vmatprep.subr.bf16.mxu0 %v6076_v62 }
 0xe5a   : > { %v4174_v12 = vpop.f32.mrb[88].mxu0 }
 0xe5b   : > { %v4237_v13 = vpack.c.bf16 %v4174_v12, %v4174_v12  ;;  %v5886_v5 = vpop.f32.mrb[89].mxu0 }
 0xe5c   : > { %v4177_v14 = vpop.f32.mrb[90].mxu0 }
 0xe5d   : > { %v5887_v15 = vpop.f32.mrb[91].mxu0  ;;  %5909 = vmatmul.mubr.msk.bf16.vlgmr.msra.gmra.mrb[96].mxu0 %vm1825_vm3, %v4237_v13  ;;  %v5199_v13 = vld [vmem:[%s7354_s15 + $0x1] ss:$0 sm:$0xff] }
 0xe5e   : > { %4583 = vmatprep.mubr.bf16.mxu0 %v6168_v1  ;;  %v5200_v14 = vld [vmem:[%s7355_s16 + $0x1] ss:$0 sm:$0xff] }
 0xe6a   : > { %v4128_v16 = vpop.f32.mrb[88].mxu1 }
 0xe6b   : > { %v4236_v19 = vpack.c.bf16 %v4128_v16, %v4128_v16  ;;  %v5880_v20 = vpop.f32.mrb[89].mxu1 }
 0xe6c   : > { %v4131_v21 = vpop.f32.mrb[90].mxu1  ;;  %v6087_v20 = vld [vmem:[%s7358_s19 + $0x80] sm:$0xff]  }
 0xe6d   : > { %v5881_v22 = vpop.f32.mrb[91].mxu1  ;;  %5903 = vmatmul.mubr.msk.bf16.vlgmr.msra.gmra.mrb[96].mxu1 %vm1825_vm3, %v4236_v19  ;;  %v6086_v19 = vld [vmem:[%s7358_s19 + $0xc0] sm:$0xff]   ;;  %v6088_v21 = vld [vmem:[%s7358_s19 + $0xc8] sm:$0xff]  }
 0xe6e   : > { %5913 = vmatpush3.bf16.msra.mxu1 %v6073_v17  ;;  %5914 = vmatprep.mubr.msk.bf16.mxu1 %vm6170_vm2, %v6169_v45  ;;  %v6089_v22 = vld [vmem:[%s7358_s19 + $0x88] sm:$0xff]  }
 0xe6f   : > { %5464 = vmatprep.subr.bf16.mxu1 %v6086_v19 }
 0xe7a   : > { %v4220_v2 = vpop.f32.mrb[92].mxu1 }
 0xe7b   : > { %v4238_v23 = vpack.c.bf16 %v4220_v2, %v4220_v2  ;;  %v5892_v24 = vpop.f32.mrb[93].mxu1  ;;  %v6090_v2 = vld [vmem:[%s7358_s19 + $0xd0] sm:$0xff]  }
 0xe7c   : > { %v4223_v25 = vpop.f32.mrb[94].mxu1  ;;  %v6092_v24 = vld [vmem:[%s7358_s19 + $0xd8] sm:$0xff]  }
 0xe7d   : > { %v5893_v1 = vpop.f32.mrb[95].mxu1  ;;  %5915 = vmatmul.mubr.msk.bf16.vlgmr.msra.gmra.mrb[100].mxu1 %vm1825_vm3, %v4238_v23  ;;  %v6091_v23 = vld [vmem:[%s7358_s19 + $0x90] sm:$0xff]   ;;  %v6093_v25 = vld [vmem:[%s7358_s19 + $0x98] sm:$0xff]  }
 0xe7e   : > { %5465 = vmatpush3.bf16.msra.mxu1 %v6087_v20  ;;  %v6094_v1 = vld [vmem:[%s7358_s19 + $0xe0] sm:$0xff]  }
 0xe7f   : > { %5466 = vmatprep.subr.bf16.mxu1 %v6088_v21 }
 0xe82   : > { %5467 = vmatpush3.bf16.msra.mxu1 %v6089_v22 }
 0xe83   : > { %5468 = vmatprep.subr.bf16.mxu1 %v6090_v2 }
 0xe86   : > { %5469 = vmatpush3.bf16.msra.mxu1 %v6091_v23 }
 0xe87   : > { %5470 = vmatprep.subr.bf16.mxu1 %v6092_v24 }
 0xe8a   : > { %5471 = vmatpush3.bf16.msra.mxu1 %v6093_v25 }
 0xe8b   : > { %5472 = vmatprep.subr.bf16.mxu1 %v6094_v1 }
 0xf20   : > { %v4282_v26 = vpop.f32.mrb[92].mxu0 }
 0xf21   : > { %v5898_v27 = vpop.f32.mrb[93].mxu0  ;;  %v4435_v37 = vsel %vm803_vm1, %v4282_v26, 0.0  ;;  %v6095_v26 = vld [vmem:[%s7358_s19 + $0xa0] sm:$0xff]  }
 0xf22   : > { %v4285_v28 = vpop.f32.mrb[94].mxu0  ;;  %5473 = vmatpush3.bf16.msra.mxu1 %v6095_v26  ;;  %v6096_v27 = vld [vmem:[%s7358_s19 + $0xe8] sm:$0xff]  }
 0xf23   : > { %v5899_v30 = vpop.f32.mrb[95].mxu0  ;;  %v6097_v28 = vld [vmem:[%s7358_s19 + $0xa8] sm:$0xff]   ;;  %5474 = vmatprep.subr.bf16.mxu1 %v6096_v27 }
 0xf24   : > { %v6098_v30 = vld [vmem:[%s7358_s19 + $0xf0] sm:$0xff]  }
 0xf26   : > { %5475 = vmatpush3.bf16.msra.mxu1 %v6097_v28 }
 0xf27   : > { %5476 = vmatprep.subr.bf16.mxu1 %v6098_v30 }
 0xf30   : > { %v4380_v32 = vpop.f32.mrb[96].mxu0 }
 0xf31   : > { %v5910_v33 = vpop.f32.mrb[97].mxu0  ;;  %v4438_v42 = vsel %vm803_vm1, %v4380_v32, 0.0  ;;  %v6099_v32 = vld [vmem:[%s7358_s19 + $0xb0] sm:$0xff]  }
 0xf32   : > { %v4383_v34 = vpop.f32.mrb[98].mxu0  ;;  %5477 = vmatpush3.bf16.msra.mxu1 %v6099_v32  ;;  %v6100_v33 = vld [vmem:[%s7358_s19 + $0xf8] sm:$0xff]  }
 0xf33   : > { %v5911_v35 = vpop.f32.mrb[99].mxu0  ;;  %v6101_v34 = vld [vmem:[%s7358_s19 + $0xb8] sm:$0xff]   ;;  %5478 = vmatprep.subr.bf16.mxu1 %v6100_v33 }
 0xf34   : > { %v5209_v35 = vld [vmem:[%s7357_s18 + $0x2] sm:$0x3] }
 0xf36   : > { %5479 = vmatpush3.bf16.msra.mxu1 %v6101_v34 }
 0xf40   : > { %v4331_v36 = vpop.f32.mrb[96].mxu1 }
 0xf41   : > { %v4436_v45 = vsel %vm803_vm1, %v4331_v36, 0.0  ;;  %v5904_v38 = vpop.f32.mrb[97].mxu1  ;;  %v4501_v36 = vrot.slane %v5209_v35, %v2520_v50 }
 0xf42   : > { %v4437_v40 = vadd.f32 %v4436_v45, %v4435_v37  ;;  %v4334_v41 = vpop.f32.mrb[98].mxu1  ;;  %v4505_v37 = vrot.slane %v5209_v35, %v2524_v52 }
 0xf43   : > { %v5905_v43 = vpop.f32.mrb[99].mxu1 }
 0xf44   : > { %v4439_v44 = vadd.f32 %v4438_v42, %v4437_v40 }
 0xf50   : > { %v4429_v47 = vpop.f32.mrb[100].mxu1 }
 0xf51   : > { %v4440_v49 = vsel %vm803_vm1, %v4429_v47, 0.0  ;;  %v5916_v51 = vpop.f32.mrb[101].mxu1 }
 0xf52   : > { %v4441_v53 = vadd.f32 %v4440_v49, %v4439_v44  ;;  %v4432_v54 = vpop.f32.mrb[102].mxu1 }
 0xf53   : > { %v5917_v56 = vpop.f32.mrb[103].mxu1 }
 0xf54   : > { %v4442_v29 = vadd.f32 %v4441_v53, %v6856_v18  ;;  %v6074_v18 = vld [vmem:[%s7356_s17 + $0x40] ss:$8 sps:$4 sm:$0xff]  }
 0xf55   : > { %4552 = vmatpush1.bf16.msra.mxu0 %v6074_v18 }
 0xf56   : > { %v7233_v58 = vadd.f32 %v5196_v55, %v4442_v29  ;;  %4553 = vmatprep.subr.bf16.mxu0 %v6079_v63 }
 0xf58   : > { %v4456_v59 = vsel %vm803_vm1, %v7233_v58, 0.0  ;;  %v4460_v60 = vmul.f32 %v7233_v58, %v7233_v58 }
 0xf59   : > { %4457 = vadd.xlane.f32.xlu0 %v4456_v59  ;;  %4554 = vmatpush1.bf16.msra.mxu0 %v6077_v48  ;;  %v5270_v48 = vld [vmem:[%s7359_s20 + $0x1] ss:$0 sm:$0xff] }
 0xf5a   : > { %v4461_v61 = vsel %vm803_vm1, %v4460_v60, 0.0  ;;  %4555 = vmatprep.subr.bf16.mxu0 %v6082_v0 }
 0xf5b   : > { %4462 = vadd.xlane.f32.xlu1 %v4461_v61 }
 0xf5d   : > { %4556 = vmatpush1.bf16.msra.mxu0 %v6080_v3 }
 0xf5e   : > { %4557 = vmatprep.subr.bf16.mxu0 %v6085_v4 }
 0xf61   : > { %4558 = vmatpush1.bf16.msra.mxu0 %v6083_v6 }
 0xfe6   : > { %v4458_v31 = vpop.xlane.xlu0 %4457 }
 0xfe7   : > { %v4459_v57 = vmul.f32 0.015625, %v4458_v31 }
 0xfe8   : > { %v4463_v7 = vpop.xlane.xlu1 %4462 }
 0xfe9   : > { %v4465_v39 = vmul.f32 %v4459_v57, %v4459_v57  ;;  %v4464_v8 = vmul.f32 0.015625, %v4463_v7  ;;  %v4467_v11 = vsub.f32 %v7233_v58, %v4459_v57 }
 0xfeb   : > { %v4466_v9 = vsub.f32 %v4464_v8, %v4465_v39 }
 0xfed   : > { %v4468_v10 = vadd.f32 1e-05, %v4466_v9 }
 0xfef   : > { %6150 = vrsqrt.f32 %v4468_v10 }
 0xff9   : > { %v6151_v12 = vpop.eup %6150 }
 0xffa   : > { %v4470_v5 = vmul.f32 %v6151_v12, %v4467_v11 }
 0xffc   : > { %v4477_v15 = vmul.f32 %v5199_v13, %v4470_v5 }
 0xffe   : > { %v4484_v16 = vadd.f32 %v5200_v14, %v4477_v15 }
0x1000   : > { %v4485_v17 = vpack.c.bf16 %v4484_v16, %v4484_v16 }
0x1002   : > { %5218 = vmatmul.mubr.msk.bf16.vlgmr.msra.gmra.mrb[100].mxu0 %vm757_vm0, %v4485_v17 }
0x10d5   : > { %v4585_v45 = vpop.f32.mrb[100].mxu0 }
0x10d6   : > { %v4586_v38 = vadd.f32 %v4585_v45, %v4501_v36  ;;  %v4587_v40 = vpop.f32.mrb[101].mxu0 }
0x10d7   : > { %v4588_v41 = vadd.f32 %v4587_v40, %v4505_v37  ;;  %v4589_v42 = vpop.f32.mrb[102].mxu0 }
0x10d8   : > { %v5219_v43 = vmul.f32 -1.702, %v4586_v38  ;;  %v4590_v44 = vpop.f32.mrb[103].mxu0 }
0x10d9   : > { %v5220_v47 = vmul.f32 -1.702, %v4588_v41 }
0x10da   : > { %v4596_v49 = vmul.f32 1.442695, %v5219_v43 }
0x10db   : > { %v4598_v51 = vmul.f32 1.442695, %v5220_v47 }
0x10dc   : > { %6152 = vpow2.f32 %v4596_v49 }
0x10dd   : > { %6154 = vpow2.f32 %v4598_v51 }
0x10e6   : > { %v6153_v53 = vpop.eup %6152 }
0x10e7   : > { %v6155_v54 = vpop.eup %6154  ;;  %v4600_v55 = vadd.f32 1.0, %v6153_v53 }
0x10e8   : > { %v4601_v50 = vadd.f32 1.0, %v6155_v54 }
0x10e9   : > { %6156 = vrcp.f32 %v4600_v55 }
0x10ea   : > { %6158 = vrcp.f32 %v4601_v50 }
0x10f3   : > { %v6157_v46 = vpop.eup %6156 }
0x10f4   : > { %v6159_v52 = vpop.eup %6158  ;;  %v4606_v56 = vmul.f32 %v6157_v46, %v4586_v38 }
0x10f5   : > { %v4607_v29 = vmul.f32 %v6159_v52, %v4588_v41 }
0x10f6   : > { %v4608_v60 = vpack.c.bf16 %v4606_v56, %v4606_v56 }
0x10f7   : > { %v4609_v59 = vpack.c.bf16 %v4607_v29, %v4607_v29 }
0x10f9   : > { %4771 = vmatprep.mubr.bf16.mxu1 %v4609_v59 }
0x10fa   : > { %4772 = vmatmul.mubr.bf16.vlgmr.msra.gmra.mrb[104].mxu1 %v4608_v60 }
0x11cd   : > { %v5480_v61 = vpop.f32.mrb[104].mxu1 }
0x11ce   : > { %v5481_v62 = vpop.f32.mrb[105].mxu1 }
0x11cf   : > { %v5482_v18 = vadd.f32 %v5481_v62, %v5480_v61  ;;  %v5483_v63 = vpop.f32.mrb[106].mxu1 }
0x11d0   : > { %v5484_v0 = vpop.f32.mrb[107].mxu1 }
0x11d1   : > { %v4779_v3 = vadd.f32 %v5482_v18, %v7233_v58 }
0x11d3   : > { %v4788_v4 = vadd.f32 %v5270_v48, %v4779_v3 }
0x11d5   : > { %4789 = vst.msk [vmem:[%s654_s26] sm:$0x1f] %vm803_vm1, %v4788_v4 }
0x11d6 PF: > { %s31_s2 = sadd.s32 1, %s6166_s2  }
0x11d7   : > { %p28_p4 = scmp.ge.s32.totalorder %s31_s2, 4  }
0x11d9   :  { %30 = sbr.rel (!%p28_p4) target bundleno = 7 (0x7), region = 150 }

</bundles_post_ra>
